<compile_context>
chip_gen: v5e
topology: v5e:2x2
jax: 0.10.0
libtpu: 0.0.40
codegen_flags: <defaults>
</compile_context>

<pallas_src>
import functools

import jax
import jax.numpy as jnp
from jax import lax
from jax.experimental import pallas as pl
from jax.experimental.pallas import tpu as pltpu


def _default_vmem_limit():
    """Per-generation scoped-VMEM budget: ~3/4 of physical, clamped to [32MB, 100MB]."""
    cap = 64 * 1024 * 1024
    try:
        info = pltpu.get_tpu_info()
        cap = int(getattr(info, "vmem_capacity_bytes", cap) or cap)
    except Exception:
        pass
    return max(32 * 1024 * 1024, min(cap * 3 // 4, 100 * 1024 * 1024))


_VMEM_LIMIT = _default_vmem_limit()


def _round_up(x, m):
    return ((x + m - 1) // m) * m


def _pick_tile(dim, target, align):
    """Largest align-multiple tile <= target that evenly divides dim; 0 if none."""
    t = (target // align) * align
    while t >= align:
        if dim % t == 0:
            return t
        t -= align
    return 0


def _tile_and_pad(dim, target, align):
    """Choose a legal (8,128)-aligned tiling. Returns (padded_dim, tile)."""
    target = max(align, (target // align) * align)
    if dim <= target:
        return dim, dim                      # full-dim block: always legal
    t = _pick_tile(dim, target, align)
    if t:
        return dim, t                        # aligned divisor found
    return _round_up(dim, target), target    # pad up (e.g. vocab 30522 -> 30720)


def _budget_tm(tm, M, N, K, tn, tk, x_bytes, out_bytes, has_res, limit):
    """Shrink tm until (acc + double-buffered tiles) fits comfortably in scoped VMEM."""
    tn_e, tk_e = min(tn, N), min(tk, K)

    def usage(tm_):
        tm_ = min(tm_, M)
        u = tm_ * tn_e * 4                    # f32 accumulator scratch
        u += 2 * tm_ * tk_e * x_bytes         # double-buffered x tile
        u += 2 * tn_e * tk_e * 2              # double-buffered bf16 weight tile
        u += 2 * tm_ * tn_e * out_bytes       # double-buffered output tile
        if has_res:
            u += 2 * tm_ * tn_e * 2           # double-buffered bf16 residual tile
        return u

    while tm > 8 and usage(tm) > limit * 0.6:
        tm //= 2
    return max(8, tm)


# ----------------------------------------------------------------------------
# Fused linear kernel:  y = act(x @ W^T + b) [+ residual] [-> LayerNorm]
# ----------------------------------------------------------------------------
def _linear_kernel(*refs, activation, fuse_residual, fuse_ln):
    it = iter(refs)
    x_ref = next(it)
    w_ref = next(it)
    b_ref = next(it)
    res_ref = next(it) if fuse_residual else None
    g_ref = next(it) if fuse_ln else None
    beta_ref = next(it) if fuse_ln else None
    o_ref = next(it)
    acc_ref = next(it)

    k = pl.program_id(2)

    @pl.when(k == 0)
    def _():
        acc_ref[...] = jnp.zeros_like(acc_ref)

    # bf16 MXU operands, f32 accumulation; W consumed in stored (N, K) layout.
    acc_ref[...] += lax.dot_general(
        x_ref[...], w_ref[...],
        dimension_numbers=(((1,), (1,)), ((), ())),
        preferred_element_type=jnp.float32)

    @pl.when(k == pl.num_programs(2) - 1)
    def _():
        y = acc_ref[...] + b_ref[...]
        if activation == "relu":
            y = jnp.maximum(y, 0.0)
        elif activation == "tanh":
            y = jnp.tanh(y)
        if fuse_residual:
            y = y + res_ref[...].astype(jnp.float32)
        if fuse_ln:
            # LayerNorm over the feature axis, eps = 1e-5 (PyTorch default), f32 math.
            mean = jnp.mean(y, axis=-1, keepdims=True)
            var = jnp.mean(jnp.square(y - mean), axis=-1, keepdims=True)
            y = (y - mean) * lax.rsqrt(var + 1e-5)
            y = y * g_ref[...] + beta_ref[...]
        o_ref[...] = y.astype(o_ref.dtype)


def fused_linear(x, w, b, *, activation="none", residual=None, ln=None,
                 out_dtype=jnp.bfloat16, tm=512, tn=512, tk=1024):
    """x: (M, K) bf16 ; w: (N, K) bf16 (PyTorch layout) ; b: (1, N) f32 -> (M, N).

    Optional fused epilogue (on the last K step): activation -> (+ residual) ->
    LayerNorm(gamma, beta).  With LN the N axis is a single full-feature tile.
    Dims that need tiling but have no 128-aligned divisor are zero-padded + sliced.
    """
    if x.dtype != jnp.bfloat16:
        x = x.astype(jnp.bfloat16)
    if w.dtype != jnp.bfloat16:
        w = w.astype(jnp.bfloat16)
    b = b.reshape(1, -1).astype(jnp.float32)

    M, K = x.shape
    N = w.shape[0]
    fuse_residual = residual is not None
    fuse_ln = ln is not None

    tn = N if fuse_ln else tn
    tm = _budget_tm(tm, M, N, K, tn, tk, 2, jnp.dtype(out_dtype).itemsize,
                    fuse_residual, _VMEM_LIMIT)

    Mp, tm = _tile_and_pad(M, tm, 8)
    Kp, tk = _tile_and_pad(K, tk, 128)
    if fuse_ln:
        Np, tn = N, N                         # full feature row per tile (LN needs it)
    else:
        Np, tn = _tile_and_pad(N, tn, 128)

    if Mp != M or Kp != K:
        x = jnp.pad(x, ((0, Mp - M), (0, Kp - K)))
    if Np != N or Kp != K:
        w = jnp.pad(w, ((0, Np - N), (0, Kp - K)))
    if Np != N:
        b = jnp.pad(b, ((0, 0), (0, Np - N)))
    if fuse_residual and Mp != M:
        residual = jnp.pad(residual, ((0, Mp - M), (0, 0)))

    inputs = [x, w, b]
    in_specs = [
        pl.BlockSpec((tm, tk), lambda i, j, k: (i, k)),
        pl.BlockSpec((tn, tk), lambda i, j, k: (j, k)),
        pl.BlockSpec((1, tn), lambda i, j, k: (0, j)),
    ]
    if fuse_residual:
        inputs.append(residual)
        in_specs.append(pl.BlockSpec((tm, tn), lambda i, j, k: (i, j)))
    if fuse_ln:
        gamma, beta = ln
        inputs.append(gamma.reshape(1, -1).astype(jnp.float32))
        inputs.append(beta.reshape(1, -1).astype(jnp.float32))
        in_specs.append(pl.BlockSpec((1, tn), lambda i, j, k: (0, j)))
        in_specs.append(pl.BlockSpec((1, tn), lambda i, j, k: (0, j)))

    out = pl.pallas_call(
        functools.partial(_linear_kernel, activation=activation,
                          fuse_residual=fuse_residual, fuse_ln=fuse_ln),
        out_shape=jax.ShapeDtypeStruct((Mp, Np), out_dtype),
        grid=(Mp // tm, Np // tn, Kp // tk),
        in_specs=in_specs,
        out_specs=pl.BlockSpec((tm, tn), lambda i, j, k: (i, j)),
        scratch_shapes=[pltpu.VMEM((tm, tn), jnp.float32)],
        compiler_params=pltpu.CompilerParams(
            dimension_semantics=("parallel", "parallel", "arbitrary"),
            vmem_limit_bytes=_VMEM_LIMIT),
    )(*inputs)

    if Mp != M or Np != N:
        out = out[:M, :N]
    return out


# ----------------------------------------------------------------------------
# Attention kernel: grid=(batch, head_group), bias built in-kernel, lane-dense out
# ----------------------------------------------------------------------------
def _attention_kernel(q_ref, k_ref, v_ref, src_ref, pad_ref, o_ref, *,
                      heads_per_group, head_dim):
    # Additive bias built in-kernel: (S,S) src_mask + (1,S) key-padding row (broadcast).
    bias = src_ref[...].astype(jnp.float32) + pad_ref[0].astype(jnp.float32)

    qg = q_ref[0]                              # (S, group_width) bf16
    kg = k_ref[0]
    vg = v_ref[0]

    outs = []
    for h in range(heads_per_group):           # static loop, fully unrolled
        lo = h * head_dim
        q = qg[:, lo:lo + head_dim]            # 1/sqrt(dh) already folded into in_proj
        k = kg[:, lo:lo + head_dim]
        v = vg[:, lo:lo + head_dim]

        s = lax.dot_general(q, k, dimension_numbers=(((1,), (1,)), ((), ())),
                            preferred_element_type=jnp.float32) + bias
        m = jnp.max(s, axis=-1, keepdims=True)
        p = jnp.exp(s - m)
        p = p * pl.reciprocal(jnp.sum(p, axis=-1, keepdims=True), approx=True)
        outs.append(lax.dot_general(p.astype(jnp.bfloat16), v,
                                    dimension_numbers=(((1,), (0,)), ((), ())),
                                    preferred_element_type=jnp.float32))

    ctx = outs[0] if heads_per_group == 1 else jnp.concatenate(outs, axis=-1)
    o_ref[0] = ctx.astype(o_ref.dtype)         # single lane-dense (S, group_width) store


def pallas_attention(q, k, v, src_mask, pad_bias, num_heads, head_dim,
                     out_dtype=jnp.bfloat16):
    # q/k/v: (B, S, E) bf16 ; src_mask: (S, S) f32 ; pad_bias: (B, 1, S) f32.
    B, S, E = q.shape

    # Head groups: fewest heads whose combined width is a multiple of 128 lanes
    # (lane-dense stores / aligned blocks); else all heads (width == E, full-dim block).
    hpg = num_heads
    for cand in range(1, num_heads + 1):
        if num_heads % cand == 0 and (cand * head_dim) % 128 == 0:
            hpg = cand
            break
    gw = hpg * head_dim
    G = num_heads // hpg

    return pl.pallas_call(
        functools.partial(_attention_kernel, heads_per_group=hpg, head_dim=head_dim),
        out_shape=jax.ShapeDtypeStruct((B, S, E), out_dtype),
        grid=(B, G),
        in_specs=[
            pl.BlockSpec((1, S, gw), lambda b, g: (b, 0, g)),
            pl.BlockSpec((1, S, gw), lambda b, g: (b, 0, g)),
            pl.BlockSpec((1, S, gw), lambda b, g: (b, 0, g)),
            pl.BlockSpec((S, S), lambda b, g: (0, 0)),
            pl.BlockSpec((1, 1, S), lambda b, g: (b, 0, 0)),
        ],
        out_specs=pl.BlockSpec((1, S, gw), lambda b, g: (b, 0, g)),
        compiler_params=pltpu.CompilerParams(
            dimension_semantics=("parallel", "parallel"),
            vmem_limit_bytes=_VMEM_LIMIT),
    )(q, k, v, src_mask, pad_bias)


# ----------------------------------------------------------------------------
# Parameters: raw (PyTorch-layout f32) init + one-time prep (bf16, folded scale)
# ----------------------------------------------------------------------------
def init_params(key, vocab_size, embed_size, ffn_num_hiddens, num_layers, max_len):
    keys = iter(jax.random.split(key, 16 + 12 * num_layers))

    def w(shape, scale=0.02):
        return (scale * jax.random.normal(next(keys), shape)).astype(jnp.float32)

    raw = {
        "token_emb": w((vocab_size, embed_size)),
        "segment_emb": w((2, embed_size)),
        "pos_emb": w((max_len, embed_size)),
        "layers": [],
        "mlm_w1": w((embed_size, embed_size)),
        "mlm_b1": jnp.zeros((embed_size,), jnp.float32),
        "mlm_ln_g": jnp.ones((embed_size,), jnp.float32),
        "mlm_ln_b": jnp.zeros((embed_size,), jnp.float32),
        "mlm_w2": w((vocab_size, embed_size)),
        "mlm_b2": jnp.zeros((vocab_size,), jnp.float32),
        "pool_w": w((embed_size, embed_size)),
        "pool_b": jnp.zeros((embed_size,), jnp.float32),
        "nsp_w": w((2, embed_size)),
        "nsp_b": jnp.zeros((2,), jnp.float32),
    }
    for _ in range(num_layers):
        raw["layers"].append({
            "in_proj_w": w((3 * embed_size, embed_size)),
            "in_proj_b": jnp.zeros((3 * embed_size,), jnp.float32),
            "out_proj_w": w((embed_size, embed_size)),
            "out_proj_b": jnp.zeros((embed_size,), jnp.float32),
            "ln1_g": jnp.ones((embed_size,), jnp.float32),
            "ln1_b": jnp.zeros((embed_size,), jnp.float32),
            "ln2_g": jnp.ones((embed_size,), jnp.float32),
            "ln2_b": jnp.zeros((embed_size,), jnp.float32),
            "ffn1_w": w((ffn_num_hiddens, embed_size)),
            "ffn1_b": jnp.zeros((ffn_num_hiddens,), jnp.float32),
            "ffn2_w": w((embed_size, ffn_num_hiddens)),
            "ffn2_b": jnp.zeros((embed_size,), jnp.float32),
        })
    return raw


def prepare_params(raw, num_heads):
    """One-time prep: bf16 weights, (1,N) f32 bias/LN rows, 1/sqrt(dh) folded into Q."""
    E = raw["token_emb"].shape[1]
    scale = 1.0 / ((E // num_heads) ** 0.5)

    def bf(x):
        return x.astype(jnp.bfloat16)

    def row(x):
        return x.reshape(1, -1).astype(jnp.float32)

    p = {
        "token_emb": raw["token_emb"],
        "segment_emb": raw["segment_emb"],
        "pos_emb": raw["pos_emb"],
        "layers": [],
        "mlm_w1": bf(raw["mlm_w1"]), "mlm_b1": row(raw["mlm_b1"]),
        "mlm_ln": (row(raw["mlm_ln_g"]), row(raw["mlm_ln_b"])),
        "mlm_w2": bf(raw["mlm_w2"]), "mlm_b2": row(raw["mlm_b2"]),
        "pool_w": bf(raw["pool_w"]), "pool_b": row(raw["pool_b"]),
        "nsp_w": bf(raw["nsp_w"]), "nsp_b": row(raw["nsp_b"]),
    }
    for lp in raw["layers"]:
        # Fold the attention scale into the Q rows of in_proj (exact rescaling).
        in_w = lp["in_proj_w"].at[:E].multiply(scale)
        in_b = lp["in_proj_b"].at[:E].multiply(scale)
        p["layers"].append({
            "in_proj_w": bf(in_w), "in_proj_b": row(in_b),
            "out_proj_w": bf(lp["out_proj_w"]), "out_proj_b": row(lp["out_proj_b"]),
            "ln1": (row(lp["ln1_g"]), row(lp["ln1_b"])),
            "ln2": (row(lp["ln2_g"]), row(lp["ln2_b"])),
            "ffn1_w": bf(lp["ffn1_w"]), "ffn1_b": row(lp["ffn1_b"]),
            "ffn2_w": bf(lp["ffn2_w"]), "ffn2_b": row(lp["ffn2_b"]),
        })
    return p


# ----------------------------------------------------------------------------
# Model forward (post-LN TransformerEncoderLayer, relu FFN — PyTorch defaults)
# ----------------------------------------------------------------------------
def encoder_layer_forward(x2, lp, num_heads, src_mask, pad_bias, B, S, E):
    dh = E // num_heads

    # Fused QKV projection (one GEMM, bf16 output feeds attention directly).
    qkv = fused_linear(x2, lp["in_proj_w"], lp["in_proj_b"]).reshape(B, S, 3 * E)
    q, k, v = qkv[:, :, :E], qkv[:, :, E:2 * E], qkv[:, :, 2 * E:]
    attn = pallas_attention(q, k, v, src_mask, pad_bias, num_heads, dh)

    # out-proj + residual + LayerNorm1 fused in one kernel.
    x2 = fused_linear(attn.reshape(B * S, E), lp["out_proj_w"], lp["out_proj_b"],
                      residual=x2, ln=lp["ln1"])
    # FFN: Linear+ReLU, then Linear + residual + LayerNorm2 fused.
    h = fused_linear(x2, lp["ffn1_w"], lp["ffn1_b"], activation="relu")
    x2 = fused_linear(h, lp["ffn2_w"], lp["ffn2_b"], residual=x2, ln=lp["ln2"])
    return x2


def bert_forward(params, tokens, segments, src_mask, src_key_padding_mask,
                 pred_positions, num_heads):
    B, S = tokens.shape
    E = params["token_emb"].shape[1]

    # Embedding gathers (plain JAX glue); encoder stack runs as a bf16 (B*S, E) slab.
    X = (params["token_emb"][tokens]
         + params["segment_emb"][segments]
         + params["pos_emb"][:S][None, :, :])
    x2 = X.astype(jnp.bfloat16).reshape(B * S, E)

    # Keep the attention bias small: (S,S) src_mask + (B,1,S) padding row;
    # the full (S,S) additive bias is assembled inside the attention kernel.
    src_bias = src_mask.astype(jnp.float32)
    pad_bias = jnp.where(src_key_padding_mask, -1e9, 0.0).astype(jnp.float32)[:, None, :]

    for lp in params["layers"]:
        x2 = encoder_layer_forward(x2, lp, num_heads, src_bias, pad_bias, B, S, E)
    enc_bf = x2.reshape(B, S, E)
    encoded_X = enc_bf.astype(jnp.float32)

    # --- MLM head on predicted positions ---
    mlm_Y_hat = None
    if pred_positions is not None:
        num_masked = pred_positions.shape[1]
        batch_idx = jnp.repeat(jnp.arange(B), num_masked)
        masked_X = enc_bf[batch_idx, pred_positions.reshape(-1)]          # (B*nm, E) bf16
        h = fused_linear(masked_X, params["mlm_w1"], params["mlm_b1"],
                         activation="relu", ln=params["mlm_ln"])
        logits = fused_linear(h, params["mlm_w2"], params["mlm_b2"],
                              out_dtype=jnp.float32)
        mlm_Y_hat = logits.reshape(B, num_masked, -1)

    # --- pool + NSP head ---
    cls = enc_bf[:, 0, :]                                                 # (B, E) bf16
    pooled = fused_linear(cls, params["pool_w"], params["pool_b"], activation="tanh")
    nsp_Y_hat = fused_linear(pooled, params["nsp_w"], params["nsp_b"],
                             out_dtype=jnp.float32)                       # (B, 2)

    return encoded_X, mlm_Y_hat, nsp_Y_hat


# ----------------------------------------------------------------------------
# Example run
# ----------------------------------------------------------------------------
if __name__ == "__main__":
    vocab_size = 128
    embed_size = 32
    ffn_num_hiddens = 64
    num_heads = 2
    num_layers = 2
    max_len = 64

    batch = 2
    seq = 8
    num_masked = 3

    raw = init_params(jax.random.PRNGKey(42), vocab_size, embed_size,
                      ffn_num_hiddens, num_layers, max_len)
    params = prepare_params(raw, num_heads)

    key = jax.random.PRNGKey(0)
    k_tok, k_seg, k_pos = jax.random.split(key, 3)
    tokens = jax.random.randint(k_tok, (batch, seq), 0, vocab_size, dtype=jnp.int32)
    segments = jax.random.randint(k_seg, (batch, seq), 0, 2, dtype=jnp.int32)
    pred_positions = jax.random.randint(k_pos, (batch, num_masked), 0, seq, dtype=jnp.int32)
    src_mask = jnp.zeros((seq, seq), jnp.float32)                 # no attention mask
    src_key_padding_mask = jnp.zeros((batch, seq), dtype=bool)    # no padding

    fwd = jax.jit(functools.partial(bert_forward, num_heads=num_heads))
    encoded_X, mlm_Y_hat, nsp_Y_hat = fwd(params, tokens, segments, src_mask,
                                          src_key_padding_mask, pred_positions)

    jax.block_until_ready((encoded_X, mlm_Y_hat, nsp_Y_hat))
    assert encoded_X.shape == (batch, seq, embed_size)
    assert mlm_Y_hat.shape == (batch, num_masked, vocab_size)
    assert nsp_Y_hat.shape == (batch, 2)
    print("KERNEL_OK")
</pallas_src>

<mosaic_0001>
module attributes {stable_mosaic.version = 11 : i64} {
  func.func @_linear_kernel(%arg0: i32, %arg1: i32, %arg2: i32, %arg3: memref<16x32xbf16, #tpu.memory_space<vmem>>, %arg4: memref<96x32xbf16, #tpu.memory_space<vmem>>, %arg5: memref<1x96xf32, #tpu.memory_space<vmem>>, %arg6: memref<16x96xbf16, #tpu.memory_space<vmem>>, %arg7: memref<16x96xf32, #tpu.memory_space<vmem>>) attributes {dimension_semantics = [#tpu.dimension_semantics<parallel>, #tpu.dimension_semantics<parallel>, #tpu.dimension_semantics<arbitrary>], iteration_bounds = array<i64: 1, 1, 1>, scalar_prefetch = 0 : i64, scratch_operands = 1 : i64, tpu.core_type = #tpu.core_type<tc>, window_params = [{transform_indices = @transform_0, window_bounds = array<i64: 16, 32>}, {transform_indices = @transform_1, window_bounds = array<i64: 96, 32>}, {transform_indices = @transform_2, window_bounds = array<i64: 1, 96>}, {transform_indices = @transform_3, window_bounds = array<i64: 16, 96>}]} {
    %c0_i32 = arith.constant 0 : i32
    %0 = arith.cmpi eq, %arg2, %c0_i32 : i32
    %1 = arith.extui %0 : i1 to i32
    %c0_i32_0 = arith.constant 0 : i32
    %2 = arith.cmpi ne, %1, %c0_i32_0 : i32
    scf.if %2 {
      %cst_10 = arith.constant 0.000000e+00 : f32
      %12 = vector.broadcast %cst_10 : f32 to vector<16x96xf32>
      %c0_11 = arith.constant 0 : index
      %c0_12 = arith.constant 0 : index
      %13 = vector.load %arg7[%c0_11, %c0_12] : memref<16x96xf32, #tpu.memory_space<vmem>>, vector<16x96xf32>
      tpu.vector_store %arg7[%c0_11, %c0_12], %12 {strides = array<i32>} : memref<16x96xf32, #tpu.memory_space<vmem>>, vector<16x96xf32>,
    } else {
    }
    %c0 = arith.constant 0 : index
    %c0_1 = arith.constant 0 : index
    %3 = vector.load %arg7[%c0, %c0_1] : memref<16x96xf32, #tpu.memory_space<vmem>>, vector<16x96xf32>
    %c0_2 = arith.constant 0 : index
    %c0_3 = arith.constant 0 : index
    %4 = vector.load %arg3[%c0_2, %c0_3] : memref<16x32xbf16, #tpu.memory_space<vmem>>, vector<16x32xbf16>
    %c0_4 = arith.constant 0 : index
    %c0_5 = arith.constant 0 : index
    %5 = vector.load %arg4[%c0_4, %c0_5] : memref<96x32xbf16, #tpu.memory_space<vmem>>, vector<96x32xbf16>
    %cst = arith.constant dense<0.000000e+00> : vector<16x96xf32>
    %6 = tpu.matmul %4, %5, %cst {dimension_numbers = #tpu.dot_dimension_numbers<[1], [1], [0], [0], [0, 0, 1, 0], [], []>} : vector<16x32xbf16>, vector<96x32xbf16>, vector<16x96xf32> -> vector<16x96xf32>
    %7 = arith.addf %3, %6 : vector<16x96xf32>
    %c0_6 = arith.constant 0 : index
    %c0_7 = arith.constant 0 : index
    %8 = vector.load %arg7[%c0_6, %c0_7] : memref<16x96xf32, #tpu.memory_space<vmem>>, vector<16x96xf32>
    tpu.vector_store %arg7[%c0_6, %c0_7], %7 {strides = array<i32>} : memref<16x96xf32, #tpu.memory_space<vmem>>, vector<16x96xf32>,
    %c0_i32_8 = arith.constant 0 : i32
    %9 = arith.cmpi eq, %arg2, %c0_i32_8 : i32
    %10 = arith.extui %9 : i1 to i32
    %c0_i32_9 = arith.constant 0 : i32
    %11 = arith.cmpi ne, %10, %c0_i32_9 : i32
    scf.if %11 {
      %c0_10 = arith.constant 0 : index
      %c0_11 = arith.constant 0 : index
      %12 = vector.load %arg7[%c0_10, %c0_11] : memref<16x96xf32, #tpu.memory_space<vmem>>, vector<16x96xf32>
      %c0_12 = arith.constant 0 : index
      %c0_13 = arith.constant 0 : index
      %13 = vector.load %arg5[%c0_12, %c0_13] : memref<1x96xf32, #tpu.memory_space<vmem>>, vector<1x96xf32>
      %14 = vector.broadcast %13 : vector<1x96xf32> to vector<16x96xf32>
      %15 = arith.addf %12, %14 : vector<16x96xf32>
      %16 = arith.truncf %15 : vector<16x96xf32> to vector<16x96xbf16>
      %c0_14 = arith.constant 0 : index
      %c0_15 = arith.constant 0 : index
      %17 = vector.load %arg6[%c0_14, %c0_15] : memref<16x96xbf16, #tpu.memory_space<vmem>>, vector<16x96xbf16>
      tpu.vector_store %arg6[%c0_14, %c0_15], %16 {strides = array<i32>} : memref<16x96xbf16, #tpu.memory_space<vmem>>, vector<16x96xbf16>,
    } else {
    }
    return
  }
  func.func @transform_0(%arg0: i32, %arg1: i32, %arg2: i32) -> (i32, i32) {
    %c0_i32 = arith.constant 0 : i32
    return %arg0, %arg2 : i32, i32
  }
  func.func @transform_1(%arg0: i32, %arg1: i32, %arg2: i32) -> (i32, i32) {
    %c0_i32 = arith.constant 0 : i32
    return %arg1, %arg2 : i32, i32
  }
  func.func @transform_2(%arg0: i32, %arg1: i32, %arg2: i32) -> (i32, i32) {
    %c0_i32 = arith.constant 0 : i32
    %c0_i32_0 = arith.constant 0 : i32
    return %c0_i32, %arg1 : i32, i32
  }
  func.func @transform_3(%arg0: i32, %arg1: i32, %arg2: i32) -> (i32, i32) {
    %c0_i32 = arith.constant 0 : i32
    return %arg0, %arg1 : i32, i32
  }
}

module attributes {stable_mosaic.version = 11 : i64} {
  func.func @_linear_kernel(%arg0: i32, %arg1: i32, %arg2: i32, %arg3: memref<16x32xbf16, #tpu.memory_space<vmem>>, %arg4: memref<32x32xbf16, #tpu.memory_space<vmem>>, %arg5: memref<1x32xf32, #tpu.memory_space<vmem>>, %arg6: memref<16x32xbf16, #tpu.memory_space<vmem>>, %arg7: memref<1x32xf32, #tpu.memory_space<vmem>>, %arg8: memref<1x32xf32, #tpu.memory_space<vmem>>, %arg9: memref<16x32xbf16, #tpu.memory_space<vmem>>, %arg10: memref<16x32xf32, #tpu.memory_space<vmem>>) attributes {dimension_semantics = [#tpu.dimension_semantics<parallel>, #tpu.dimension_semantics<parallel>, #tpu.dimension_semantics<arbitrary>], iteration_bounds = array<i64: 1, 1, 1>, scalar_prefetch = 0 : i64, scratch_operands = 1 : i64, tpu.core_type = #tpu.core_type<tc>, window_params = [{transform_indices = @transform_0, window_bounds = array<i64: 16, 32>}, {transform_indices = @transform_1, window_bounds = array<i64: 32, 32>}, {transform_indices = @transform_2, window_bounds = array<i64: 1, 32>}, {transform_indices = @transform_3, window_bounds = array<i64: 16, 32>}, {transform_indices = @transform_4, window_bounds = array<i64: 1, 32>}, {transform_indices = @transform_5, window_bounds = array<i64: 1, 32>}, {transform_indices = @transform_6, window_bounds = array<i64: 16, 32>}]} {
    %c0_i32 = arith.constant 0 : i32
    %0 = arith.cmpi eq, %arg2, %c0_i32 : i32
    %1 = arith.extui %0 : i1 to i32
    %c0_i32_0 = arith.constant 0 : i32
    %2 = arith.cmpi ne, %1, %c0_i32_0 : i32
    scf.if %2 {
      %cst_10 = arith.constant 0.000000e+00 : f32
      %12 = vector.broadcast %cst_10 : f32 to vector<16x32xf32>
      %c0_11 = arith.constant 0 : index
      %c0_12 = arith.constant 0 : index
      %13 = vector.load %arg10[%c0_11, %c0_12] : memref<16x32xf32, #tpu.memory_space<vmem>>, vector<16x32xf32>
      tpu.vector_store %arg10[%c0_11, %c0_12], %12 {strides = array<i32>} : memref<16x32xf32, #tpu.memory_space<vmem>>, vector<16x32xf32>,
    } else {
    }
    %c0 = arith.constant 0 : index
    %c0_1 = arith.constant 0 : index
    %3 = vector.load %arg10[%c0, %c0_1] : memref<16x32xf32, #tpu.memory_space<vmem>>, vector<16x32xf32>
    %c0_2 = arith.constant 0 : index
    %c0_3 = arith.constant 0 : index
    %4 = vector.load %arg3[%c0_2, %c0_3] : memref<16x32xbf16, #tpu.memory_space<vmem>>, vector<16x32xbf16>
    %c0_4 = arith.constant 0 : index
    %c0_5 = arith.constant 0 : index
    %5 = vector.load %arg4[%c0_4, %c0_5] : memref<32x32xbf16, #tpu.memory_space<vmem>>, vector<32x32xbf16>
    %cst = arith.constant dense<0.000000e+00> : vector<16x32xf32>
    %6 = tpu.matmul %4, %5, %cst {dimension_numbers = #tpu.dot_dimension_numbers<[1], [1], [0], [0], [0, 0, 1, 0], [], []>} : vector<16x32xbf16>, vector<32x32xbf16>, vector<16x32xf32> -> vector<16x32xf32>
    %7 = arith.addf %3, %6 : vector<16x32xf32>
    %c0_6 = arith.constant 0 : index
    %c0_7 = arith.constant 0 : index
    %8 = vector.load %arg10[%c0_6, %c0_7] : memref<16x32xf32, #tpu.memory_space<vmem>>, vector<16x32xf32>
    tpu.vector_store %arg10[%c0_6, %c0_7], %7 {strides = array<i32>} : memref<16x32xf32, #tpu.memory_space<vmem>>, vector<16x32xf32>,
    %c0_i32_8 = arith.constant 0 : i32
    %9 = arith.cmpi eq, %arg2, %c0_i32_8 : i32
    %10 = arith.extui %9 : i1 to i32
    %c0_i32_9 = arith.constant 0 : i32
    %11 = arith.cmpi ne, %10, %c0_i32_9 : i32
    scf.if %11 {
      %c0_10 = arith.constant 0 : index
      %c0_11 = arith.constant 0 : index
      %12 = vector.load %arg10[%c0_10, %c0_11] : memref<16x32xf32, #tpu.memory_space<vmem>>, vector<16x32xf32>
      %c0_12 = arith.constant 0 : index
      %c0_13 = arith.constant 0 : index
      %13 = vector.load %arg5[%c0_12, %c0_13] : memref<1x32xf32, #tpu.memory_space<vmem>>, vector<1x32xf32>
      %14 = vector.broadcast %13 : vector<1x32xf32> to vector<16x32xf32>
      %15 = arith.addf %12, %14 : vector<16x32xf32>
      %c0_14 = arith.constant 0 : index
      %c0_15 = arith.constant 0 : index
      %16 = vector.load %arg6[%c0_14, %c0_15] : memref<16x32xbf16, #tpu.memory_space<vmem>>, vector<16x32xbf16>
      %17 = arith.extf %16 : vector<16x32xbf16> to vector<16x32xf32>
      %18 = arith.addf %15, %17 : vector<16x32xf32>
      %cst_16 = arith.constant dense<0.000000e+00> : vector<16xf32>
      %19 = vector.multi_reduction <add>, %18, %cst_16 [1] : vector<16x32xf32> to vector<16xf32>
      %20 = vector.shape_cast %19 : vector<16xf32> to vector<16x1xf32>
      %cst_17 = arith.constant 3.200000e+01 : f32
      %21 = vector.broadcast %cst_17 : f32 to vector<16x1xf32>
      %22 = arith.divf %20, %21 : vector<16x1xf32>
      %23 = vector.broadcast %22 : vector<16x1xf32> to vector<16x32xf32>
      %24 = arith.subf %18, %23 : vector<16x32xf32>
      %25 = arith.mulf %24, %24 : vector<16x32xf32>
      %cst_18 = arith.constant dense<0.000000e+00> : vector<16xf32>
      %26 = vector.multi_reduction <add>, %25, %cst_18 [1] : vector<16x32xf32> to vector<16xf32>
      %27 = vector.shape_cast %26 : vector<16xf32> to vector<16x1xf32>
      %cst_19 = arith.constant 3.200000e+01 : f32
      %28 = vector.broadcast %cst_19 : f32 to vector<16x1xf32>
      %29 = arith.divf %27, %28 : vector<16x1xf32>
      %30 = vector.broadcast %22 : vector<16x1xf32> to vector<16x32xf32>
      %31 = arith.subf %18, %30 : vector<16x32xf32>
      %cst_20 = arith.constant 9.99999974E-6 : f32
      %32 = vector.broadcast %cst_20 : f32 to vector<16x1xf32>
      %33 = arith.addf %29, %32 : vector<16x1xf32>
      %34 = math.rsqrt %33 : vector<16x1xf32>
      %35 = vector.broadcast %34 : vector<16x1xf32> to vector<16x32xf32>
      %36 = arith.mulf %31, %35 : vector<16x32xf32>
      %c0_21 = arith.constant 0 : index
      %c0_22 = arith.constant 0 : index
      %37 = vector.load %arg7[%c0_21, %c0_22] : memref<1x32xf32, #tpu.memory_space<vmem>>, vector<1x32xf32>
      %38 = vector.broadcast %37 : vector<1x32xf32> to vector<16x32xf32>
      %39 = arith.mulf %36, %38 : vector<16x32xf32>
      %c0_23 = arith.constant 0 : index
      %c0_24 = arith.constant 0 : index
      %40 = vector.load %arg8[%c0_23, %c0_24] : memref<1x32xf32, #tpu.memory_space<vmem>>, vector<1x32xf32>
      %41 = vector.broadcast %40 : vector<1x32xf32> to vector<16x32xf32>
      %42 = arith.addf %39, %41 : vector<16x32xf32>
      %43 = arith.truncf %42 : vector<16x32xf32> to vector<16x32xbf16>
      %c0_25 = arith.constant 0 : index
      %c0_26 = arith.constant 0 : index
      %44 = vector.load %arg9[%c0_25, %c0_26] : memref<16x32xbf16, #tpu.memory_space<vmem>>, vector<16x32xbf16>
      tpu.vector_store %arg9[%c0_25, %c0_26], %43 {strides = array<i32>} : memref<16x32xbf16, #tpu.memory_space<vmem>>, vector<16x32xbf16>,
    } else {
    }
    return
  }
  func.func @transform_0(%arg0: i32, %arg1: i32, %arg2: i32) -> (i32, i32) {
    %c0_i32 = arith.constant 0 : i32
    return %arg0, %arg2 : i32, i32
  }
  func.func @transform_1(%arg0: i32, %arg1: i32, %arg2: i32) -> (i32, i32) {
    %c0_i32 = arith.constant 0 : i32
    return %arg1, %arg2 : i32, i32
  }
  func.func @transform_2(%arg0: i32, %arg1: i32, %arg2: i32) -> (i32, i32) {
    %c0_i32 = arith.constant 0 : i32
    %c0_i32_0 = arith.constant 0 : i32
    return %c0_i32, %arg1 : i32, i32
  }
  func.func @transform_3(%arg0: i32, %arg1: i32, %arg2: i32) -> (i32, i32) {
    %c0_i32 = arith.constant 0 : i32
    return %arg0, %arg1 : i32, i32
  }
  func.func @transform_4(%arg0: i32, %arg1: i32, %arg2: i32) -> (i32, i32) {
    %c0_i32 = arith.constant 0 : i32
    %c0_i32_0 = arith.constant 0 : i32
    return %c0_i32, %arg1 : i32, i32
  }
  func.func @transform_5(%arg0: i32, %arg1: i32, %arg2: i32) -> (i32, i32) {
    %c0_i32 = arith.constant 0 : i32
    %c0_i32_0 = arith.constant 0 : i32
    return %c0_i32, %arg1 : i32, i32
  }
  func.func @transform_6(%arg0: i32, %arg1: i32, %arg2: i32) -> (i32, i32) {
    %c0_i32 = arith.constant 0 : i32
    return %arg0, %arg1 : i32, i32
  }
}

module attributes {stable_mosaic.version = 11 : i64} {
  func.func @_attention_kernel(%arg0: i32, %arg1: i32, %arg2: memref<1x8x32xbf16, #tpu.memory_space<vmem>>, %arg3: memref<1x8x32xbf16, #tpu.memory_space<vmem>>, %arg4: memref<1x8x32xbf16, #tpu.memory_space<vmem>>, %arg5: memref<8x8xf32, #tpu.memory_space<vmem>>, %arg6: memref<1x1x8xf32, #tpu.memory_space<vmem>>, %arg7: memref<1x8x32xbf16, #tpu.memory_space<vmem>>) attributes {dimension_semantics = [#tpu.dimension_semantics<parallel>, #tpu.dimension_semantics<parallel>], iteration_bounds = array<i64: 2, 1>, scalar_prefetch = 0 : i64, scratch_operands = 0 : i64, tpu.core_type = #tpu.core_type<tc>, window_params = [{transform_indices = @transform_0, window_bounds = array<i64: 1, 8, 32>}, {transform_indices = @transform_1, window_bounds = array<i64: 1, 8, 32>}, {transform_indices = @transform_2, window_bounds = array<i64: 1, 8, 32>}, {pipeline_mode = #tpu.pipeline_mode<synchronous>, transform_indices = @transform_3, window_bounds = array<i64: 8, 8>}, {transform_indices = @transform_4, window_bounds = array<i64: 1, 1, 8>}, {transform_indices = @transform_5, window_bounds = array<i64: 1, 8, 32>}]} {
    %c0 = arith.constant 0 : index
    %c0_0 = arith.constant 0 : index
    %0 = vector.load %arg5[%c0, %c0_0] : memref<8x8xf32, #tpu.memory_space<vmem>>, vector<8x8xf32>
    %c0_1 = arith.constant 0 : index
    %c0_2 = arith.constant 0 : index
    %c0_3 = arith.constant 0 : index
    %1 = vector.load %arg6[%c0_1, %c0_2, %c0_3] : memref<1x1x8xf32, #tpu.memory_space<vmem>>, vector<1x1x8xf32>
    %2 = vector.shape_cast %1 : vector<1x1x8xf32> to vector<1x8xf32>
    %3 = vector.broadcast %2 : vector<1x8xf32> to vector<8x8xf32>
    %4 = arith.addf %0, %3 : vector<8x8xf32>
    %c0_4 = arith.constant 0 : index
    %c0_5 = arith.constant 0 : index
    %c0_6 = arith.constant 0 : index
    %5 = vector.load %arg2[%c0_4, %c0_5, %c0_6] : memref<1x8x32xbf16, #tpu.memory_space<vmem>>, vector<1x8x32xbf16>
    %6 = vector.shape_cast %5 : vector<1x8x32xbf16> to vector<8x32xbf16>
    %c0_7 = arith.constant 0 : index
    %c0_8 = arith.constant 0 : index
    %c0_9 = arith.constant 0 : index
    %7 = vector.load %arg3[%c0_7, %c0_8, %c0_9] : memref<1x8x32xbf16, #tpu.memory_space<vmem>>, vector<1x8x32xbf16>
    %8 = vector.shape_cast %7 : vector<1x8x32xbf16> to vector<8x32xbf16>
    %c0_10 = arith.constant 0 : index
    %c0_11 = arith.constant 0 : index
    %c0_12 = arith.constant 0 : index
    %9 = vector.load %arg4[%c0_10, %c0_11, %c0_12] : memref<1x8x32xbf16, #tpu.memory_space<vmem>>, vector<1x8x32xbf16>
    %10 = vector.shape_cast %9 : vector<1x8x32xbf16> to vector<8x32xbf16>
    %11 = vector.extract_strided_slice %6 {offsets = [0, 0], sizes = [8, 16], strides = [1, 1]} : vector<8x32xbf16> to vector<8x16xbf16>
    %12 = vector.extract_strided_slice %8 {offsets = [0, 0], sizes = [8, 16], strides = [1, 1]} : vector<8x32xbf16> to vector<8x16xbf16>
    %13 = vector.extract_strided_slice %10 {offsets = [0, 0], sizes = [8, 16], strides = [1, 1]} : vector<8x32xbf16> to vector<8x16xbf16>
    %cst = arith.constant dense<0.000000e+00> : vector<8x8xf32>
    %14 = tpu.matmul %11, %12, %cst {dimension_numbers = #tpu.dot_dimension_numbers<[1], [1], [0], [0], [0, 0, 1, 0], [], []>} : vector<8x16xbf16>, vector<8x16xbf16>, vector<8x8xf32> -> vector<8x8xf32>
    %15 = arith.addf %14, %4 : vector<8x8xf32>
    %cst_13 = arith.constant dense<0xFF800000> : vector<8xf32>
    %16 = vector.multi_reduction <maximumf>, %15, %cst_13 [1] : vector<8x8xf32> to vector<8xf32>
    %17 = vector.shape_cast %16 : vector<8xf32> to vector<8x1xf32>
    %18 = vector.broadcast %17 : vector<8x1xf32> to vector<8x8xf32>
    %19 = arith.subf %15, %18 : vector<8x8xf32>
    %20 = math.exp %19 : vector<8x8xf32>
    %cst_14 = arith.constant dense<0.000000e+00> : vector<8xf32>
    %21 = vector.multi_reduction <add>, %20, %cst_14 [1] : vector<8x8xf32> to vector<8xf32>
    %22 = vector.shape_cast %21 : vector<8xf32> to vector<8x1xf32>
    %23 = tpu.reciprocal %22 {approx = true} : vector<8x1xf32> -> vector<8x1xf32>
    %24 = vector.broadcast %23 : vector<8x1xf32> to vector<8x8xf32>
    %25 = arith.mulf %20, %24 : vector<8x8xf32>
    %26 = arith.truncf %25 : vector<8x8xf32> to vector<8x8xbf16>
    %cst_15 = arith.constant dense<0.000000e+00> : vector<8x16xf32>
    %27 = tpu.matmul %26, %13, %cst_15 {dimension_numbers = #tpu.dot_dimension_numbers<[1], [0], [0], [1], [0, 0, 1, 1], [], []>} : vector<8x8xbf16>, vector<8x16xbf16>, vector<8x16xf32> -> vector<8x16xf32>
    %28 = vector.extract_strided_slice %6 {offsets = [0, 16], sizes = [8, 16], strides = [1, 1]} : vector<8x32xbf16> to vector<8x16xbf16>
    %29 = vector.extract_strided_slice %8 {offsets = [0, 16], sizes = [8, 16], strides = [1, 1]} : vector<8x32xbf16> to vector<8x16xbf16>
    %30 = vector.extract_strided_slice %10 {offsets = [0, 16], sizes = [8, 16], strides = [1, 1]} : vector<8x32xbf16> to vector<8x16xbf16>
    %cst_16 = arith.constant dense<0.000000e+00> : vector<8x8xf32>
    %31 = tpu.matmul %28, %29, %cst_16 {dimension_numbers = #tpu.dot_dimension_numbers<[1], [1], [0], [0], [0, 0, 1, 0], [], []>} : vector<8x16xbf16>, vector<8x16xbf16>, vector<8x8xf32> -> vector<8x8xf32>
    %32 = arith.addf %31, %4 : vector<8x8xf32>
    %cst_17 = arith.constant dense<0xFF800000> : vector<8xf32>
    %33 = vector.multi_reduction <maximumf>, %32, %cst_17 [1] : vector<8x8xf32> to vector<8xf32>
    %34 = vector.shape_cast %33 : vector<8xf32> to vector<8x1xf32>
    %35 = vector.broadcast %34 : vector<8x1xf32> to vector<8x8xf32>
    %36 = arith.subf %32, %35 : vector<8x8xf32>
    %37 = math.exp %36 : vector<8x8xf32>
    %cst_18 = arith.constant dense<0.000000e+00> : vector<8xf32>
    %38 = vector.multi_reduction <add>, %37, %cst_18 [1] : vector<8x8xf32> to vector<8xf32>
    %39 = vector.shape_cast %38 : vector<8xf32> to vector<8x1xf32>
    %40 = tpu.reciprocal %39 {approx = true} : vector<8x1xf32> -> vector<8x1xf32>
    %41 = vector.broadcast %40 : vector<8x1xf32> to vector<8x8xf32>
    %42 = arith.mulf %37, %41 : vector<8x8xf32>
    %43 = arith.truncf %42 : vector<8x8xf32> to vector<8x8xbf16>
    %cst_19 = arith.constant dense<0.000000e+00> : vector<8x16xf32>
    %44 = tpu.matmul %43, %30, %cst_19 {dimension_numbers = #tpu.dot_dimension_numbers<[1], [0], [0], [1], [0, 0, 1, 1], [], []>} : vector<8x8xbf16>, vector<8x16xbf16>, vector<8x16xf32> -> vector<8x16xf32>
    %45 = tpu.concatenate %27, %44 in 1 : vector<8x16xf32>, vector<8x16xf32> -> vector<8x32xf32>
    %46 = arith.truncf %45 : vector<8x32xf32> to vector<8x32xbf16>
    %c0_20 = arith.constant 0 : index
    %c0_21 = arith.constant 0 : index
    %c0_22 = arith.constant 0 : index
    %47 = vector.load %arg7[%c0_20, %c0_21, %c0_22] : memref<1x8x32xbf16, #tpu.memory_space<vmem>>, vector<1x8x32xbf16>
    %48 = vector.shape_cast %47 : vector<1x8x32xbf16> to vector<8x32xbf16>
    %49 = vector.shape_cast %46 : vector<8x32xbf16> to vector<1x8x32xbf16>
    tpu.vector_store %arg7[%c0_20, %c0_21, %c0_22], %49 {strides = array<i32>} : memref<1x8x32xbf16, #tpu.memory_space<vmem>>, vector<1x8x32xbf16>,
    return
  }
  func.func @transform_0(%arg0: i32, %arg1: i32) -> (i32, i32, i32) {
    %c0_i32 = arith.constant 0 : i32
    %c0_i32_0 = arith.constant 0 : i32
    return %arg0, %c0_i32, %arg1 : i32, i32, i32
  }
  func.func @transform_1(%arg0: i32, %arg1: i32) -> (i32, i32, i32) {
    %c0_i32 = arith.constant 0 : i32
    %c0_i32_0 = arith.constant 0 : i32
    return %arg0, %c0_i32, %arg1 : i32, i32, i32
  }
  func.func @transform_2(%arg0: i32, %arg1: i32) -> (i32, i32, i32) {
    %c0_i32 = arith.constant 0 : i32
    %c0_i32_0 = arith.constant 0 : i32
    return %arg0, %c0_i32, %arg1 : i32, i32, i32
  }
  func.func @transform_3(%arg0: i32, %arg1: i32) -> (i32, i32) {
    %c0_i32 = arith.constant 0 : i32
    %c0_i32_0 = arith.constant 0 : i32
    %c0_i32_1 = arith.constant 0 : i32
    return %c0_i32, %c0_i32_0 : i32, i32
  }
  func.func @transform_4(%arg0: i32, %arg1: i32) -> (i32, i32, i32) {
    %c0_i32 = arith.constant 0 : i32
    %c0_i32_0 = arith.constant 0 : i32
    %c0_i32_1 = arith.constant 0 : i32
    return %arg0, %c0_i32, %c0_i32_0 : i32, i32, i32
  }
  func.func @transform_5(%arg0: i32, %arg1: i32) -> (i32, i32, i32) {
    %c0_i32 = arith.constant 0 : i32
    %c0_i32_0 = arith.constant 0 : i32
    return %arg0, %c0_i32, %arg1 : i32, i32, i32
  }
}

module attributes {stable_mosaic.version = 11 : i64} {
  func.func @_linear_kernel(%arg0: i32, %arg1: i32, %arg2: i32, %arg3: memref<16x32xbf16, #tpu.memory_space<vmem>>, %arg4: memref<64x32xbf16, #tpu.memory_space<vmem>>, %arg5: memref<1x64xf32, #tpu.memory_space<vmem>>, %arg6: memref<16x64xbf16, #tpu.memory_space<vmem>>, %arg7: memref<16x64xf32, #tpu.memory_space<vmem>>) attributes {dimension_semantics = [#tpu.dimension_semantics<parallel>, #tpu.dimension_semantics<parallel>, #tpu.dimension_semantics<arbitrary>], iteration_bounds = array<i64: 1, 1, 1>, scalar_prefetch = 0 : i64, scratch_operands = 1 : i64, tpu.core_type = #tpu.core_type<tc>, window_params = [{transform_indices = @transform_0, window_bounds = array<i64: 16, 32>}, {transform_indices = @transform_1, window_bounds = array<i64: 64, 32>}, {transform_indices = @transform_2, window_bounds = array<i64: 1, 64>}, {transform_indices = @transform_3, window_bounds = array<i64: 16, 64>}]} {
    %c0_i32 = arith.constant 0 : i32
    %0 = arith.cmpi eq, %arg2, %c0_i32 : i32
    %1 = arith.extui %0 : i1 to i32
    %c0_i32_0 = arith.constant 0 : i32
    %2 = arith.cmpi ne, %1, %c0_i32_0 : i32
    scf.if %2 {
      %cst_10 = arith.constant 0.000000e+00 : f32
      %12 = vector.broadcast %cst_10 : f32 to vector<16x64xf32>
      %c0_11 = arith.constant 0 : index
      %c0_12 = arith.constant 0 : index
      %13 = vector.load %arg7[%c0_11, %c0_12] : memref<16x64xf32, #tpu.memory_space<vmem>>, vector<16x64xf32>
      tpu.vector_store %arg7[%c0_11, %c0_12], %12 {strides = array<i32>} : memref<16x64xf32, #tpu.memory_space<vmem>>, vector<16x64xf32>,
    } else {
    }
    %c0 = arith.constant 0 : index
    %c0_1 = arith.constant 0 : index
    %3 = vector.load %arg7[%c0, %c0_1] : memref<16x64xf32, #tpu.memory_space<vmem>>, vector<16x64xf32>
    %c0_2 = arith.constant 0 : index
    %c0_3 = arith.constant 0 : index
    %4 = vector.load %arg3[%c0_2, %c0_3] : memref<16x32xbf16, #tpu.memory_space<vmem>>, vector<16x32xbf16>
    %c0_4 = arith.constant 0 : index
    %c0_5 = arith.constant 0 : index
    %5 = vector.load %arg4[%c0_4, %c0_5] : memref<64x32xbf16, #tpu.memory_space<vmem>>, vector<64x32xbf16>
    %cst = arith.constant dense<0.000000e+00> : vector<16x64xf32>
    %6 = tpu.matmul %4, %5, %cst {dimension_numbers = #tpu.dot_dimension_numbers<[1], [1], [0], [0], [0, 0, 1, 0], [], []>} : vector<16x32xbf16>, vector<64x32xbf16>, vector<16x64xf32> -> vector<16x64xf32>
    %7 = arith.addf %3, %6 : vector<16x64xf32>
    %c0_6 = arith.constant 0 : index
    %c0_7 = arith.constant 0 : index
    %8 = vector.load %arg7[%c0_6, %c0_7] : memref<16x64xf32, #tpu.memory_space<vmem>>, vector<16x64xf32>
    tpu.vector_store %arg7[%c0_6, %c0_7], %7 {strides = array<i32>} : memref<16x64xf32, #tpu.memory_space<vmem>>, vector<16x64xf32>,
    %c0_i32_8 = arith.constant 0 : i32
    %9 = arith.cmpi eq, %arg2, %c0_i32_8 : i32
    %10 = arith.extui %9 : i1 to i32
    %c0_i32_9 = arith.constant 0 : i32
    %11 = arith.cmpi ne, %10, %c0_i32_9 : i32
    scf.if %11 {
      %c0_10 = arith.constant 0 : index
      %c0_11 = arith.constant 0 : index
      %12 = vector.load %arg7[%c0_10, %c0_11] : memref<16x64xf32, #tpu.memory_space<vmem>>, vector<16x64xf32>
      %c0_12 = arith.constant 0 : index
      %c0_13 = arith.constant 0 : index
      %13 = vector.load %arg5[%c0_12, %c0_13] : memref<1x64xf32, #tpu.memory_space<vmem>>, vector<1x64xf32>
      %14 = vector.broadcast %13 : vector<1x64xf32> to vector<16x64xf32>
      %15 = arith.addf %12, %14 : vector<16x64xf32>
      %cst_14 = arith.constant 0.000000e+00 : f32
      %16 = vector.broadcast %cst_14 : f32 to vector<16x64xf32>
      %17 = arith.maximumf %15, %16 : vector<16x64xf32>
      %18 = arith.truncf %17 : vector<16x64xf32> to vector<16x64xbf16>
      %c0_15 = arith.constant 0 : index
      %c0_16 = arith.constant 0 : index
      %19 = vector.load %arg6[%c0_15, %c0_16] : memref<16x64xbf16, #tpu.memory_space<vmem>>, vector<16x64xbf16>
      tpu.vector_store %arg6[%c0_15, %c0_16], %18 {strides = array<i32>} : memref<16x64xbf16, #tpu.memory_space<vmem>>, vector<16x64xbf16>,
    } else {
    }
    return
  }
  func.func @transform_0(%arg0: i32, %arg1: i32, %arg2: i32) -> (i32, i32) {
    %c0_i32 = arith.constant 0 : i32
    return %arg0, %arg2 : i32, i32
  }
  func.func @transform_1(%arg0: i32, %arg1: i32, %arg2: i32) -> (i32, i32) {
    %c0_i32 = arith.constant 0 : i32
    return %arg1, %arg2 : i32, i32
  }
  func.func @transform_2(%arg0: i32, %arg1: i32, %arg2: i32) -> (i32, i32) {
    %c0_i32 = arith.constant 0 : i32
    %c0_i32_0 = arith.constant 0 : i32
    return %c0_i32, %arg1 : i32, i32
  }
  func.func @transform_3(%arg0: i32, %arg1: i32, %arg2: i32) -> (i32, i32) {
    %c0_i32 = arith.constant 0 : i32
    return %arg0, %arg1 : i32, i32
  }
}

module attributes {stable_mosaic.version = 11 : i64} {
  func.func @_linear_kernel(%arg0: i32, %arg1: i32, %arg2: i32, %arg3: memref<16x64xbf16, #tpu.memory_space<vmem>>, %arg4: memref<32x64xbf16, #tpu.memory_space<vmem>>, %arg5: memref<1x32xf32, #tpu.memory_space<vmem>>, %arg6: memref<16x32xbf16, #tpu.memory_space<vmem>>, %arg7: memref<1x32xf32, #tpu.memory_space<vmem>>, %arg8: memref<1x32xf32, #tpu.memory_space<vmem>>, %arg9: memref<16x32xbf16, #tpu.memory_space<vmem>>, %arg10: memref<16x32xf32, #tpu.memory_space<vmem>>) attributes {dimension_semantics = [#tpu.dimension_semantics<parallel>, #tpu.dimension_semantics<parallel>, #tpu.dimension_semantics<arbitrary>], iteration_bounds = array<i64: 1, 1, 1>, scalar_prefetch = 0 : i64, scratch_operands = 1 : i64, tpu.core_type = #tpu.core_type<tc>, window_params = [{transform_indices = @transform_0, window_bounds = array<i64: 16, 64>}, {transform_indices = @transform_1, window_bounds = array<i64: 32, 64>}, {transform_indices = @transform_2, window_bounds = array<i64: 1, 32>}, {transform_indices = @transform_3, window_bounds = array<i64: 16, 32>}, {transform_indices = @transform_4, window_bounds = array<i64: 1, 32>}, {transform_indices = @transform_5, window_bounds = array<i64: 1, 32>}, {transform_indices = @transform_6, window_bounds = array<i64: 16, 32>}]} {
    %c0_i32 = arith.constant 0 : i32
    %0 = arith.cmpi eq, %arg2, %c0_i32 : i32
    %1 = arith.extui %0 : i1 to i32
    %c0_i32_0 = arith.constant 0 : i32
    %2 = arith.cmpi ne, %1, %c0_i32_0 : i32
    scf.if %2 {
      %cst_10 = arith.constant 0.000000e+00 : f32
      %12 = vector.broadcast %cst_10 : f32 to vector<16x32xf32>
      %c0_11 = arith.constant 0 : index
      %c0_12 = arith.constant 0 : index
      %13 = vector.load %arg10[%c0_11, %c0_12] : memref<16x32xf32, #tpu.memory_space<vmem>>, vector<16x32xf32>
      tpu.vector_store %arg10[%c0_11, %c0_12], %12 {strides = array<i32>} : memref<16x32xf32, #tpu.memory_space<vmem>>, vector<16x32xf32>,
    } else {
    }
    %c0 = arith.constant 0 : index
    %c0_1 = arith.constant 0 : index
    %3 = vector.load %arg10[%c0, %c0_1] : memref<16x32xf32, #tpu.memory_space<vmem>>, vector<16x32xf32>
    %c0_2 = arith.constant 0 : index
    %c0_3 = arith.constant 0 : index
    %4 = vector.load %arg3[%c0_2, %c0_3] : memref<16x64xbf16, #tpu.memory_space<vmem>>, vector<16x64xbf16>
    %c0_4 = arith.constant 0 : index
    %c0_5 = arith.constant 0 : index
    %5 = vector.load %arg4[%c0_4, %c0_5] : memref<32x64xbf16, #tpu.memory_space<vmem>>, vector<32x64xbf16>
    %cst = arith.constant dense<0.000000e+00> : vector<16x32xf32>
    %6 = tpu.matmul %4, %5, %cst {dimension_numbers = #tpu.dot_dimension_numbers<[1], [1], [0], [0], [0, 0, 1, 0], [], []>} : vector<16x64xbf16>, vector<32x64xbf16>, vector<16x32xf32> -> vector<16x32xf32>
    %7 = arith.addf %3, %6 : vector<16x32xf32>
    %c0_6 = arith.constant 0 : index
    %c0_7 = arith.constant 0 : index
    %8 = vector.load %arg10[%c0_6, %c0_7] : memref<16x32xf32, #tpu.memory_space<vmem>>, vector<16x32xf32>
    tpu.vector_store %arg10[%c0_6, %c0_7], %7 {strides = array<i32>} : memref<16x32xf32, #tpu.memory_space<vmem>>, vector<16x32xf32>,
    %c0_i32_8 = arith.constant 0 : i32
    %9 = arith.cmpi eq, %arg2, %c0_i32_8 : i32
    %10 = arith.extui %9 : i1 to i32
    %c0_i32_9 = arith.constant 0 : i32
    %11 = arith.cmpi ne, %10, %c0_i32_9 : i32
    scf.if %11 {
      %c0_10 = arith.constant 0 : index
      %c0_11 = arith.constant 0 : index
      %12 = vector.load %arg10[%c0_10, %c0_11] : memref<16x32xf32, #tpu.memory_space<vmem>>, vector<16x32xf32>
      %c0_12 = arith.constant 0 : index
      %c0_13 = arith.constant 0 : index
      %13 = vector.load %arg5[%c0_12, %c0_13] : memref<1x32xf32, #tpu.memory_space<vmem>>, vector<1x32xf32>
      %14 = vector.broadcast %13 : vector<1x32xf32> to vector<16x32xf32>
      %15 = arith.addf %12, %14 : vector<16x32xf32>
      %c0_14 = arith.constant 0 : index
      %c0_15 = arith.constant 0 : index
      %16 = vector.load %arg6[%c0_14, %c0_15] : memref<16x32xbf16, #tpu.memory_space<vmem>>, vector<16x32xbf16>
      %17 = arith.extf %16 : vector<16x32xbf16> to vector<16x32xf32>
      %18 = arith.addf %15, %17 : vector<16x32xf32>
      %cst_16 = arith.constant dense<0.000000e+00> : vector<16xf32>
      %19 = vector.multi_reduction <add>, %18, %cst_16 [1] : vector<16x32xf32> to vector<16xf32>
      %20 = vector.shape_cast %19 : vector<16xf32> to vector<16x1xf32>
      %cst_17 = arith.constant 3.200000e+01 : f32
      %21 = vector.broadcast %cst_17 : f32 to vector<16x1xf32>
      %22 = arith.divf %20, %21 : vector<16x1xf32>
      %23 = vector.broadcast %22 : vector<16x1xf32> to vector<16x32xf32>
      %24 = arith.subf %18, %23 : vector<16x32xf32>
      %25 = arith.mulf %24, %24 : vector<16x32xf32>
      %cst_18 = arith.constant dense<0.000000e+00> : vector<16xf32>
      %26 = vector.multi_reduction <add>, %25, %cst_18 [1] : vector<16x32xf32> to vector<16xf32>
      %27 = vector.shape_cast %26 : vector<16xf32> to vector<16x1xf32>
      %cst_19 = arith.constant 3.200000e+01 : f32
      %28 = vector.broadcast %cst_19 : f32 to vector<16x1xf32>
      %29 = arith.divf %27, %28 : vector<16x1xf32>
      %30 = vector.broadcast %22 : vector<16x1xf32> to vector<16x32xf32>
      %31 = arith.subf %18, %30 : vector<16x32xf32>
      %cst_20 = arith.constant 9.99999974E-6 : f32
      %32 = vector.broadcast %cst_20 : f32 to vector<16x1xf32>
      %33 = arith.addf %29, %32 : vector<16x1xf32>
      %34 = math.rsqrt %33 : vector<16x1xf32>
      %35 = vector.broadcast %34 : vector<16x1xf32> to vector<16x32xf32>
      %36 = arith.mulf %31, %35 : vector<16x32xf32>
      %c0_21 = arith.constant 0 : index
      %c0_22 = arith.constant 0 : index
      %37 = vector.load %arg7[%c0_21, %c0_22] : memref<1x32xf32, #tpu.memory_space<vmem>>, vector<1x32xf32>
      %38 = vector.broadcast %37 : vector<1x32xf32> to vector<16x32xf32>
      %39 = arith.mulf %36, %38 : vector<16x32xf32>
      %c0_23 = arith.constant 0 : index
      %c0_24 = arith.constant 0 : index
      %40 = vector.load %arg8[%c0_23, %c0_24] : memref<1x32xf32, #tpu.memory_space<vmem>>, vector<1x32xf32>
      %41 = vector.broadcast %40 : vector<1x32xf32> to vector<16x32xf32>
      %42 = arith.addf %39, %41 : vector<16x32xf32>
      %43 = arith.truncf %42 : vector<16x32xf32> to vector<16x32xbf16>
      %c0_25 = arith.constant 0 : index
      %c0_26 = arith.constant 0 : index
      %44 = vector.load %arg9[%c0_25, %c0_26] : memref<16x32xbf16, #tpu.memory_space<vmem>>, vector<16x32xbf16>
      tpu.vector_store %arg9[%c0_25, %c0_26], %43 {strides = array<i32>} : memref<16x32xbf16, #tpu.memory_space<vmem>>, vector<16x32xbf16>,
    } else {
    }
    return
  }
  func.func @transform_0(%arg0: i32, %arg1: i32, %arg2: i32) -> (i32, i32) {
    %c0_i32 = arith.constant 0 : i32
    return %arg0, %arg2 : i32, i32
  }
  func.func @transform_1(%arg0: i32, %arg1: i32, %arg2: i32) -> (i32, i32) {
    %c0_i32 = arith.constant 0 : i32
    return %arg1, %arg2 : i32, i32
  }
  func.func @transform_2(%arg0: i32, %arg1: i32, %arg2: i32) -> (i32, i32) {
    %c0_i32 = arith.constant 0 : i32
    %c0_i32_0 = arith.constant 0 : i32
    return %c0_i32, %arg1 : i32, i32
  }
  func.func @transform_3(%arg0: i32, %arg1: i32, %arg2: i32) -> (i32, i32) {
    %c0_i32 = arith.constant 0 : i32
    return %arg0, %arg1 : i32, i32
  }
  func.func @transform_4(%arg0: i32, %arg1: i32, %arg2: i32) -> (i32, i32) {
    %c0_i32 = arith.constant 0 : i32
    %c0_i32_0 = arith.constant 0 : i32
    return %c0_i32, %arg1 : i32, i32
  }
  func.func @transform_5(%arg0: i32, %arg1: i32, %arg2: i32) -> (i32, i32) {
    %c0_i32 = arith.constant 0 : i32
    %c0_i32_0 = arith.constant 0 : i32
    return %c0_i32, %arg1 : i32, i32
  }
  func.func @transform_6(%arg0: i32, %arg1: i32, %arg2: i32) -> (i32, i32) {
    %c0_i32 = arith.constant 0 : i32
    return %arg0, %arg1 : i32, i32
  }
}

module attributes {stable_mosaic.version = 11 : i64} {
  func.func @_linear_kernel(%arg0: i32, %arg1: i32, %arg2: i32, %arg3: memref<6x32xbf16, #tpu.memory_space<vmem>>, %arg4: memref<32x32xbf16, #tpu.memory_space<vmem>>, %arg5: memref<1x32xf32, #tpu.memory_space<vmem>>, %arg6: memref<1x32xf32, #tpu.memory_space<vmem>>, %arg7: memref<1x32xf32, #tpu.memory_space<vmem>>, %arg8: memref<6x32xbf16, #tpu.memory_space<vmem>>, %arg9: memref<6x32xf32, #tpu.memory_space<vmem>>) attributes {dimension_semantics = [#tpu.dimension_semantics<parallel>, #tpu.dimension_semantics<parallel>, #tpu.dimension_semantics<arbitrary>], iteration_bounds = array<i64: 1, 1, 1>, scalar_prefetch = 0 : i64, scratch_operands = 1 : i64, tpu.core_type = #tpu.core_type<tc>, window_params = [{transform_indices = @transform_0, window_bounds = array<i64: 6, 32>}, {transform_indices = @transform_1, window_bounds = array<i64: 32, 32>}, {transform_indices = @transform_2, window_bounds = array<i64: 1, 32>}, {transform_indices = @transform_3, window_bounds = array<i64: 1, 32>}, {transform_indices = @transform_4, window_bounds = array<i64: 1, 32>}, {transform_indices = @transform_5, window_bounds = array<i64: 6, 32>}]} {
    %c0_i32 = arith.constant 0 : i32
    %0 = arith.cmpi eq, %arg2, %c0_i32 : i32
    %1 = arith.extui %0 : i1 to i32
    %c0_i32_0 = arith.constant 0 : i32
    %2 = arith.cmpi ne, %1, %c0_i32_0 : i32
    scf.if %2 {
      %cst_10 = arith.constant 0.000000e+00 : f32
      %12 = vector.broadcast %cst_10 : f32 to vector<6x32xf32>
      %c0_11 = arith.constant 0 : index
      %c0_12 = arith.constant 0 : index
      %13 = vector.load %arg9[%c0_11, %c0_12] : memref<6x32xf32, #tpu.memory_space<vmem>>, vector<6x32xf32>
      tpu.vector_store %arg9[%c0_11, %c0_12], %12 {strides = array<i32>} : memref<6x32xf32, #tpu.memory_space<vmem>>, vector<6x32xf32>,
    } else {
    }
    %c0 = arith.constant 0 : index
    %c0_1 = arith.constant 0 : index
    %3 = vector.load %arg9[%c0, %c0_1] : memref<6x32xf32, #tpu.memory_space<vmem>>, vector<6x32xf32>
    %c0_2 = arith.constant 0 : index
    %c0_3 = arith.constant 0 : index
    %4 = vector.load %arg3[%c0_2, %c0_3] : memref<6x32xbf16, #tpu.memory_space<vmem>>, vector<6x32xbf16>
    %c0_4 = arith.constant 0 : index
    %c0_5 = arith.constant 0 : index
    %5 = vector.load %arg4[%c0_4, %c0_5] : memref<32x32xbf16, #tpu.memory_space<vmem>>, vector<32x32xbf16>
    %cst = arith.constant dense<0.000000e+00> : vector<6x32xf32>
    %6 = tpu.matmul %4, %5, %cst {dimension_numbers = #tpu.dot_dimension_numbers<[1], [1], [0], [0], [0, 0, 1, 0], [], []>} : vector<6x32xbf16>, vector<32x32xbf16>, vector<6x32xf32> -> vector<6x32xf32>
    %7 = arith.addf %3, %6 : vector<6x32xf32>
    %c0_6 = arith.constant 0 : index
    %c0_7 = arith.constant 0 : index
    %8 = vector.load %arg9[%c0_6, %c0_7] : memref<6x32xf32, #tpu.memory_space<vmem>>, vector<6x32xf32>
    tpu.vector_store %arg9[%c0_6, %c0_7], %7 {strides = array<i32>} : memref<6x32xf32, #tpu.memory_space<vmem>>, vector<6x32xf32>,
    %c0_i32_8 = arith.constant 0 : i32
    %9 = arith.cmpi eq, %arg2, %c0_i32_8 : i32
    %10 = arith.extui %9 : i1 to i32
    %c0_i32_9 = arith.constant 0 : i32
    %11 = arith.cmpi ne, %10, %c0_i32_9 : i32
    scf.if %11 {
      %c0_10 = arith.constant 0 : index
      %c0_11 = arith.constant 0 : index
      %12 = vector.load %arg9[%c0_10, %c0_11] : memref<6x32xf32, #tpu.memory_space<vmem>>, vector<6x32xf32>
      %c0_12 = arith.constant 0 : index
      %c0_13 = arith.constant 0 : index
      %13 = vector.load %arg5[%c0_12, %c0_13] : memref<1x32xf32, #tpu.memory_space<vmem>>, vector<1x32xf32>
      %14 = vector.broadcast %13 : vector<1x32xf32> to vector<6x32xf32>
      %15 = arith.addf %12, %14 : vector<6x32xf32>
      %cst_14 = arith.constant 0.000000e+00 : f32
      %16 = vector.broadcast %cst_14 : f32 to vector<6x32xf32>
      %17 = arith.maximumf %15, %16 : vector<6x32xf32>
      %cst_15 = arith.constant dense<0.000000e+00> : vector<6xf32>
      %18 = vector.multi_reduction <add>, %17, %cst_15 [1] : vector<6x32xf32> to vector<6xf32>
      %19 = vector.shape_cast %18 : vector<6xf32> to vector<6x1xf32>
      %cst_16 = arith.constant 3.200000e+01 : f32
      %20 = vector.broadcast %cst_16 : f32 to vector<6x1xf32>
      %21 = arith.divf %19, %20 : vector<6x1xf32>
      %22 = vector.broadcast %21 : vector<6x1xf32> to vector<6x32xf32>
      %23 = arith.subf %17, %22 : vector<6x32xf32>
      %24 = arith.mulf %23, %23 : vector<6x32xf32>
      %cst_17 = arith.constant dense<0.000000e+00> : vector<6xf32>
      %25 = vector.multi_reduction <add>, %24, %cst_17 [1] : vector<6x32xf32> to vector<6xf32>
      %26 = vector.shape_cast %25 : vector<6xf32> to vector<6x1xf32>
      %cst_18 = arith.constant 3.200000e+01 : f32
      %27 = vector.broadcast %cst_18 : f32 to vector<6x1xf32>
      %28 = arith.divf %26, %27 : vector<6x1xf32>
      %29 = vector.broadcast %21 : vector<6x1xf32> to vector<6x32xf32>
      %30 = arith.subf %17, %29 : vector<6x32xf32>
      %cst_19 = arith.constant 9.99999974E-6 : f32
      %31 = vector.broadcast %cst_19 : f32 to vector<6x1xf32>
      %32 = arith.addf %28, %31 : vector<6x1xf32>
      %33 = math.rsqrt %32 : vector<6x1xf32>
      %34 = vector.broadcast %33 : vector<6x1xf32> to vector<6x32xf32>
      %35 = arith.mulf %30, %34 : vector<6x32xf32>
      %c0_20 = arith.constant 0 : index
      %c0_21 = arith.constant 0 : index
      %36 = vector.load %arg6[%c0_20, %c0_21] : memref<1x32xf32, #tpu.memory_space<vmem>>, vector<1x32xf32>
      %37 = vector.broadcast %36 : vector<1x32xf32> to vector<6x32xf32>
      %38 = arith.mulf %35, %37 : vector<6x32xf32>
      %c0_22 = arith.constant 0 : index
      %c0_23 = arith.constant 0 : index
      %39 = vector.load %arg7[%c0_22, %c0_23] : memref<1x32xf32, #tpu.memory_space<vmem>>, vector<1x32xf32>
      %40 = vector.broadcast %39 : vector<1x32xf32> to vector<6x32xf32>
      %41 = arith.addf %38, %40 : vector<6x32xf32>
      %42 = arith.truncf %41 : vector<6x32xf32> to vector<6x32xbf16>
      %c0_24 = arith.constant 0 : index
      %c0_25 = arith.constant 0 : index
      %43 = vector.load %arg8[%c0_24, %c0_25] : memref<6x32xbf16, #tpu.memory_space<vmem>>, vector<6x32xbf16>
      tpu.vector_store %arg8[%c0_24, %c0_25], %42 {strides = array<i32>} : memref<6x32xbf16, #tpu.memory_space<vmem>>, vector<6x32xbf16>,
    } else {
    }
    return
  }
  func.func @transform_0(%arg0: i32, %arg1: i32, %arg2: i32) -> (i32, i32) {
    %c0_i32 = arith.constant 0 : i32
    return %arg0, %arg2 : i32, i32
  }
  func.func @transform_1(%arg0: i32, %arg1: i32, %arg2: i32) -> (i32, i32) {
    %c0_i32 = arith.constant 0 : i32
    return %arg1, %arg2 : i32, i32
  }
  func.func @transform_2(%arg0: i32, %arg1: i32, %arg2: i32) -> (i32, i32) {
    %c0_i32 = arith.constant 0 : i32
    %c0_i32_0 = arith.constant 0 : i32
    return %c0_i32, %arg1 : i32, i32
  }
  func.func @transform_3(%arg0: i32, %arg1: i32, %arg2: i32) -> (i32, i32) {
    %c0_i32 = arith.constant 0 : i32
    %c0_i32_0 = arith.constant 0 : i32
    return %c0_i32, %arg1 : i32, i32
  }
  func.func @transform_4(%arg0: i32, %arg1: i32, %arg2: i32) -> (i32, i32) {
    %c0_i32 = arith.constant 0 : i32
    %c0_i32_0 = arith.constant 0 : i32
    return %c0_i32, %arg1 : i32, i32
  }
  func.func @transform_5(%arg0: i32, %arg1: i32, %arg2: i32) -> (i32, i32) {
    %c0_i32 = arith.constant 0 : i32
    return %arg0, %arg1 : i32, i32
  }
}

module attributes {stable_mosaic.version = 11 : i64} {
  func.func @_linear_kernel(%arg0: i32, %arg1: i32, %arg2: i32, %arg3: memref<6x32xbf16, #tpu.memory_space<vmem>>, %arg4: memref<128x32xbf16, #tpu.memory_space<vmem>>, %arg5: memref<1x128xf32, #tpu.memory_space<vmem>>, %arg6: memref<6x128xf32, #tpu.memory_space<vmem>>, %arg7: memref<6x128xf32, #tpu.memory_space<vmem>>) attributes {dimension_semantics = [#tpu.dimension_semantics<parallel>, #tpu.dimension_semantics<parallel>, #tpu.dimension_semantics<arbitrary>], iteration_bounds = array<i64: 1, 1, 1>, scalar_prefetch = 0 : i64, scratch_operands = 1 : i64, tpu.core_type = #tpu.core_type<tc>, window_params = [{transform_indices = @transform_0, window_bounds = array<i64: 6, 32>}, {transform_indices = @transform_1, window_bounds = array<i64: 128, 32>}, {transform_indices = @transform_2, window_bounds = array<i64: 1, 128>}, {transform_indices = @transform_3, window_bounds = array<i64: 6, 128>}]} {
    %c0_i32 = arith.constant 0 : i32
    %0 = arith.cmpi eq, %arg2, %c0_i32 : i32
    %1 = arith.extui %0 : i1 to i32
    %c0_i32_0 = arith.constant 0 : i32
    %2 = arith.cmpi ne, %1, %c0_i32_0 : i32
    scf.if %2 {
      %cst_10 = arith.constant 0.000000e+00 : f32
      %12 = vector.broadcast %cst_10 : f32 to vector<6x128xf32>
      %c0_11 = arith.constant 0 : index
      %c0_12 = arith.constant 0 : index
      %13 = vector.load %arg7[%c0_11, %c0_12] : memref<6x128xf32, #tpu.memory_space<vmem>>, vector<6x128xf32>
      tpu.vector_store %arg7[%c0_11, %c0_12], %12 {strides = array<i32>} : memref<6x128xf32, #tpu.memory_space<vmem>>, vector<6x128xf32>,
    } else {
    }
    %c0 = arith.constant 0 : index
    %c0_1 = arith.constant 0 : index
    %3 = vector.load %arg7[%c0, %c0_1] : memref<6x128xf32, #tpu.memory_space<vmem>>, vector<6x128xf32>
    %c0_2 = arith.constant 0 : index
    %c0_3 = arith.constant 0 : index
    %4 = vector.load %arg3[%c0_2, %c0_3] : memref<6x32xbf16, #tpu.memory_space<vmem>>, vector<6x32xbf16>
    %c0_4 = arith.constant 0 : index
    %c0_5 = arith.constant 0 : index
    %5 = vector.load %arg4[%c0_4, %c0_5] : memref<128x32xbf16, #tpu.memory_space<vmem>>, vector<128x32xbf16>
    %cst = arith.constant dense<0.000000e+00> : vector<6x128xf32>
    %6 = tpu.matmul %4, %5, %cst {dimension_numbers = #tpu.dot_dimension_numbers<[1], [1], [0], [0], [0, 0, 1, 0], [], []>} : vector<6x32xbf16>, vector<128x32xbf16>, vector<6x128xf32> -> vector<6x128xf32>
    %7 = arith.addf %3, %6 : vector<6x128xf32>
    %c0_6 = arith.constant 0 : index
    %c0_7 = arith.constant 0 : index
    %8 = vector.load %arg7[%c0_6, %c0_7] : memref<6x128xf32, #tpu.memory_space<vmem>>, vector<6x128xf32>
    tpu.vector_store %arg7[%c0_6, %c0_7], %7 {strides = array<i32>} : memref<6x128xf32, #tpu.memory_space<vmem>>, vector<6x128xf32>,
    %c0_i32_8 = arith.constant 0 : i32
    %9 = arith.cmpi eq, %arg2, %c0_i32_8 : i32
    %10 = arith.extui %9 : i1 to i32
    %c0_i32_9 = arith.constant 0 : i32
    %11 = arith.cmpi ne, %10, %c0_i32_9 : i32
    scf.if %11 {
      %c0_10 = arith.constant 0 : index
      %c0_11 = arith.constant 0 : index
      %12 = vector.load %arg7[%c0_10, %c0_11] : memref<6x128xf32, #tpu.memory_space<vmem>>, vector<6x128xf32>
      %c0_12 = arith.constant 0 : index
      %c0_13 = arith.constant 0 : index
      %13 = vector.load %arg5[%c0_12, %c0_13] : memref<1x128xf32, #tpu.memory_space<vmem>>, vector<1x128xf32>
      %14 = vector.broadcast %13 : vector<1x128xf32> to vector<6x128xf32>
      %15 = arith.addf %12, %14 : vector<6x128xf32>
      %c0_14 = arith.constant 0 : index
      %c0_15 = arith.constant 0 : index
      %16 = vector.load %arg6[%c0_14, %c0_15] : memref<6x128xf32, #tpu.memory_space<vmem>>, vector<6x128xf32>
      tpu.vector_store %arg6[%c0_14, %c0_15], %15 {strides = array<i32>} : memref<6x128xf32, #tpu.memory_space<vmem>>, vector<6x128xf32>,
    } else {
    }
    return
  }
  func.func @transform_0(%arg0: i32, %arg1: i32, %arg2: i32) -> (i32, i32) {
    %c0_i32 = arith.constant 0 : i32
    return %arg0, %arg2 : i32, i32
  }
  func.func @transform_1(%arg0: i32, %arg1: i32, %arg2: i32) -> (i32, i32) {
    %c0_i32 = arith.constant 0 : i32
    return %arg1, %arg2 : i32, i32
  }
  func.func @transform_2(%arg0: i32, %arg1: i32, %arg2: i32) -> (i32, i32) {
    %c0_i32 = arith.constant 0 : i32
    %c0_i32_0 = arith.constant 0 : i32
    return %c0_i32, %arg1 : i32, i32
  }
  func.func @transform_3(%arg0: i32, %arg1: i32, %arg2: i32) -> (i32, i32) {
    %c0_i32 = arith.constant 0 : i32
    return %arg0, %arg1 : i32, i32
  }
}

module attributes {stable_mosaic.version = 11 : i64} {
  func.func @_linear_kernel(%arg0: i32, %arg1: i32, %arg2: i32, %arg3: memref<2x32xbf16, #tpu.memory_space<vmem>>, %arg4: memref<32x32xbf16, #tpu.memory_space<vmem>>, %arg5: memref<1x32xf32, #tpu.memory_space<vmem>>, %arg6: memref<2x32xbf16, #tpu.memory_space<vmem>>, %arg7: memref<2x32xf32, #tpu.memory_space<vmem>>) attributes {dimension_semantics = [#tpu.dimension_semantics<parallel>, #tpu.dimension_semantics<parallel>, #tpu.dimension_semantics<arbitrary>], iteration_bounds = array<i64: 1, 1, 1>, scalar_prefetch = 0 : i64, scratch_operands = 1 : i64, tpu.core_type = #tpu.core_type<tc>, window_params = [{transform_indices = @transform_0, window_bounds = array<i64: 2, 32>}, {transform_indices = @transform_1, window_bounds = array<i64: 32, 32>}, {transform_indices = @transform_2, window_bounds = array<i64: 1, 32>}, {transform_indices = @transform_3, window_bounds = array<i64: 2, 32>}]} {
    %c0_i32 = arith.constant 0 : i32
    %0 = arith.cmpi eq, %arg2, %c0_i32 : i32
    %1 = arith.extui %0 : i1 to i32
    %c0_i32_0 = arith.constant 0 : i32
    %2 = arith.cmpi ne, %1, %c0_i32_0 : i32
    scf.if %2 {
      %cst_10 = arith.constant 0.000000e+00 : f32
      %12 = vector.broadcast %cst_10 : f32 to vector<2x32xf32>
      %c0_11 = arith.constant 0 : index
      %c0_12 = arith.constant 0 : index
      %13 = vector.load %arg7[%c0_11, %c0_12] : memref<2x32xf32, #tpu.memory_space<vmem>>, vector<2x32xf32>
      tpu.vector_store %arg7[%c0_11, %c0_12], %12 {strides = array<i32>} : memref<2x32xf32, #tpu.memory_space<vmem>>, vector<2x32xf32>,
    } else {
    }
    %c0 = arith.constant 0 : index
    %c0_1 = arith.constant 0 : index
    %3 = vector.load %arg7[%c0, %c0_1] : memref<2x32xf32, #tpu.memory_space<vmem>>, vector<2x32xf32>
    %c0_2 = arith.constant 0 : index
    %c0_3 = arith.constant 0 : index
    %4 = vector.load %arg3[%c0_2, %c0_3] : memref<2x32xbf16, #tpu.memory_space<vmem>>, vector<2x32xbf16>
    %c0_4 = arith.constant 0 : index
    %c0_5 = arith.constant 0 : index
    %5 = vector.load %arg4[%c0_4, %c0_5] : memref<32x32xbf16, #tpu.memory_space<vmem>>, vector<32x32xbf16>
    %cst = arith.constant dense<0.000000e+00> : vector<2x32xf32>
    %6 = tpu.matmul %4, %5, %cst {dimension_numbers = #tpu.dot_dimension_numbers<[1], [1], [0], [0], [0, 0, 1, 0], [], []>} : vector<2x32xbf16>, vector<32x32xbf16>, vector<2x32xf32> -> vector<2x32xf32>
    %7 = arith.addf %3, %6 : vector<2x32xf32>
    %c0_6 = arith.constant 0 : index
    %c0_7 = arith.constant 0 : index
    %8 = vector.load %arg7[%c0_6, %c0_7] : memref<2x32xf32, #tpu.memory_space<vmem>>, vector<2x32xf32>
    tpu.vector_store %arg7[%c0_6, %c0_7], %7 {strides = array<i32>} : memref<2x32xf32, #tpu.memory_space<vmem>>, vector<2x32xf32>,
    %c0_i32_8 = arith.constant 0 : i32
    %9 = arith.cmpi eq, %arg2, %c0_i32_8 : i32
    %10 = arith.extui %9 : i1 to i32
    %c0_i32_9 = arith.constant 0 : i32
    %11 = arith.cmpi ne, %10, %c0_i32_9 : i32
    scf.if %11 {
      %c0_10 = arith.constant 0 : index
      %c0_11 = arith.constant 0 : index
      %12 = vector.load %arg7[%c0_10, %c0_11] : memref<2x32xf32, #tpu.memory_space<vmem>>, vector<2x32xf32>
      %c0_12 = arith.constant 0 : index
      %c0_13 = arith.constant 0 : index
      %13 = vector.load %arg5[%c0_12, %c0_13] : memref<1x32xf32, #tpu.memory_space<vmem>>, vector<1x32xf32>
      %14 = vector.broadcast %13 : vector<1x32xf32> to vector<2x32xf32>
      %15 = arith.addf %12, %14 : vector<2x32xf32>
      %16 = math.tanh %15 : vector<2x32xf32>
      %17 = arith.truncf %16 : vector<2x32xf32> to vector<2x32xbf16>
      %c0_14 = arith.constant 0 : index
      %c0_15 = arith.constant 0 : index
      %18 = vector.load %arg6[%c0_14, %c0_15] : memref<2x32xbf16, #tpu.memory_space<vmem>>, vector<2x32xbf16>
      tpu.vector_store %arg6[%c0_14, %c0_15], %17 {strides = array<i32>} : memref<2x32xbf16, #tpu.memory_space<vmem>>, vector<2x32xbf16>,
    } else {
    }
    return
  }
  func.func @transform_0(%arg0: i32, %arg1: i32, %arg2: i32) -> (i32, i32) {
    %c0_i32 = arith.constant 0 : i32
    return %arg0, %arg2 : i32, i32
  }
  func.func @transform_1(%arg0: i32, %arg1: i32, %arg2: i32) -> (i32, i32) {
    %c0_i32 = arith.constant 0 : i32
    return %arg1, %arg2 : i32, i32
  }
  func.func @transform_2(%arg0: i32, %arg1: i32, %arg2: i32) -> (i32, i32) {
    %c0_i32 = arith.constant 0 : i32
    %c0_i32_0 = arith.constant 0 : i32
    return %c0_i32, %arg1 : i32, i32
  }
  func.func @transform_3(%arg0: i32, %arg1: i32, %arg2: i32) -> (i32, i32) {
    %c0_i32 = arith.constant 0 : i32
    return %arg0, %arg1 : i32, i32
  }
}

module attributes {stable_mosaic.version = 11 : i64} {
  func.func @_linear_kernel(%arg0: i32, %arg1: i32, %arg2: i32, %arg3: memref<2x32xbf16, #tpu.memory_space<vmem>>, %arg4: memref<2x32xbf16, #tpu.memory_space<vmem>>, %arg5: memref<1x2xf32, #tpu.memory_space<vmem>>, %arg6: memref<2x2xf32, #tpu.memory_space<vmem>>, %arg7: memref<2x2xf32, #tpu.memory_space<vmem>>) attributes {dimension_semantics = [#tpu.dimension_semantics<parallel>, #tpu.dimension_semantics<parallel>, #tpu.dimension_semantics<arbitrary>], iteration_bounds = array<i64: 1, 1, 1>, scalar_prefetch = 0 : i64, scratch_operands = 1 : i64, tpu.core_type = #tpu.core_type<tc>, window_params = [{transform_indices = @transform_0, window_bounds = array<i64: 2, 32>}, {transform_indices = @transform_1, window_bounds = array<i64: 2, 32>}, {transform_indices = @transform_2, window_bounds = array<i64: 1, 2>}, {transform_indices = @transform_3, window_bounds = array<i64: 2, 2>}]} {
    %c0_i32 = arith.constant 0 : i32
    %0 = arith.cmpi eq, %arg2, %c0_i32 : i32
    %1 = arith.extui %0 : i1 to i32
    %c0_i32_0 = arith.constant 0 : i32
    %2 = arith.cmpi ne, %1, %c0_i32_0 : i32
    scf.if %2 {
      %cst_10 = arith.constant 0.000000e+00 : f32
      %12 = vector.broadcast %cst_10 : f32 to vector<2x2xf32>
      %c0_11 = arith.constant 0 : index
      %c0_12 = arith.constant 0 : index
      %13 = vector.load %arg7[%c0_11, %c0_12] : memref<2x2xf32, #tpu.memory_space<vmem>>, vector<2x2xf32>
      tpu.vector_store %arg7[%c0_11, %c0_12], %12 {strides = array<i32>} : memref<2x2xf32, #tpu.memory_space<vmem>>, vector<2x2xf32>,
    } else {
    }
    %c0 = arith.constant 0 : index
    %c0_1 = arith.constant 0 : index
    %3 = vector.load %arg7[%c0, %c0_1] : memref<2x2xf32, #tpu.memory_space<vmem>>, vector<2x2xf32>
    %c0_2 = arith.constant 0 : index
    %c0_3 = arith.constant 0 : index
    %4 = vector.load %arg3[%c0_2, %c0_3] : memref<2x32xbf16, #tpu.memory_space<vmem>>, vector<2x32xbf16>
    %c0_4 = arith.constant 0 : index
    %c0_5 = arith.constant 0 : index
    %5 = vector.load %arg4[%c0_4, %c0_5] : memref<2x32xbf16, #tpu.memory_space<vmem>>, vector<2x32xbf16>
    %cst = arith.constant dense<0.000000e+00> : vector<2x2xf32>
    %6 = tpu.matmul %4, %5, %cst {dimension_numbers = #tpu.dot_dimension_numbers<[1], [1], [0], [0], [0, 0, 1, 0], [], []>} : vector<2x32xbf16>, vector<2x32xbf16>, vector<2x2xf32> -> vector<2x2xf32>
    %7 = arith.addf %3, %6 : vector<2x2xf32>
    %c0_6 = arith.constant 0 : index
    %c0_7 = arith.constant 0 : index
    %8 = vector.load %arg7[%c0_6, %c0_7] : memref<2x2xf32, #tpu.memory_space<vmem>>, vector<2x2xf32>
    tpu.vector_store %arg7[%c0_6, %c0_7], %7 {strides = array<i32>} : memref<2x2xf32, #tpu.memory_space<vmem>>, vector<2x2xf32>,
    %c0_i32_8 = arith.constant 0 : i32
    %9 = arith.cmpi eq, %arg2, %c0_i32_8 : i32
    %10 = arith.extui %9 : i1 to i32
    %c0_i32_9 = arith.constant 0 : i32
    %11 = arith.cmpi ne, %10, %c0_i32_9 : i32
    scf.if %11 {
      %c0_10 = arith.constant 0 : index
      %c0_11 = arith.constant 0 : index
      %12 = vector.load %arg7[%c0_10, %c0_11] : memref<2x2xf32, #tpu.memory_space<vmem>>, vector<2x2xf32>
      %c0_12 = arith.constant 0 : index
      %c0_13 = arith.constant 0 : index
      %13 = vector.load %arg5[%c0_12, %c0_13] : memref<1x2xf32, #tpu.memory_space<vmem>>, vector<1x2xf32>
      %14 = vector.broadcast %13 : vector<1x2xf32> to vector<2x2xf32>
      %15 = arith.addf %12, %14 : vector<2x2xf32>
      %c0_14 = arith.constant 0 : index
      %c0_15 = arith.constant 0 : index
      %16 = vector.load %arg6[%c0_14, %c0_15] : memref<2x2xf32, #tpu.memory_space<vmem>>, vector<2x2xf32>
      tpu.vector_store %arg6[%c0_14, %c0_15], %15 {strides = array<i32>} : memref<2x2xf32, #tpu.memory_space<vmem>>, vector<2x2xf32>,
    } else {
    }
    return
  }
  func.func @transform_0(%arg0: i32, %arg1: i32, %arg2: i32) -> (i32, i32) {
    %c0_i32 = arith.constant 0 : i32
    return %arg0, %arg2 : i32, i32
  }
  func.func @transform_1(%arg0: i32, %arg1: i32, %arg2: i32) -> (i32, i32) {
    %c0_i32 = arith.constant 0 : i32
    return %arg1, %arg2 : i32, i32
  }
  func.func @transform_2(%arg0: i32, %arg1: i32, %arg2: i32) -> (i32, i32) {
    %c0_i32 = arith.constant 0 : i32
    %c0_i32_0 = arith.constant 0 : i32
    return %c0_i32, %arg1 : i32, i32
  }
  func.func @transform_3(%arg0: i32, %arg1: i32, %arg2: i32) -> (i32, i32) {
    %c0_i32 = arith.constant 0 : i32
    return %arg0, %arg1 : i32, i32
  }
}

</mosaic_0001>

<bundles_post_ra>
// kernel: bert_forward.16
= control target key start
LH: loop header
LB: loop body
LE: loop exit
PB: predicated region body
PF: predicated region fallthrough
CT: control target
= control target key end

     0   :  { %vm28_vm0 = vcmask 261120   ;;  %v202_v1 = vmov 0.0   ;;  %v203_v24 = vmov 32.0   ;;  %vm164_vm6 = vcmask 257024   ;;  %s277_s1 = inlined_call_operand.vmem [shape: bf16[32,32], index: 1, kind: input, shape index: {}]   ;;  %s278_s0 = inlined_call_operand.vmem [shape: bf16[16,32], index: 0, kind: input, shape index: {}]   ;;  %s279_s2 = inlined_call_operand.vmem [shape: f32[1,32], index: 2, kind: input, shape index: {}]   ;;  %s280_s3 = inlined_call_operand.vmem [shape: bf16[16,32], index: 3, kind: input, shape index: {}]   ;;  %s281_s4 = inlined_call_operand.vmem [shape: f32[1,32], index: 4, kind: input, shape index: {}]   ;;  %s282_s5 = inlined_call_operand.vmem [shape: f32[1,32], index: 5, kind: input, shape index: {}]   ;;  %s283_s6 = inlined_call_operand.vmem [shape: bf16[16,32], index: 6, kind: output, shape index: {}]  }
   0x1   :  { %v186_v0 = vld [vmem:[%s277_s1 + $0x8] sm:$0xff]  ;;  %29 = vst.msk [vmem:[#allocation2] sm:$0xff] %vm28_vm0, %v202_v1  ;;  %v185_v3 = vld [vmem:[%s277_s1] sm:$0xff]  ;;  %196 = vrcp.f32 %v203_v24 }
   0x2   :  { %30 = vst.msk [vmem:[#allocation2 + $0x8] sm:$0xff] %vm28_vm0, %v202_v1  ;;  %v62_v2 = vsel %vm28_vm0, %v186_v0, 0  ;;  %v59_v4 = vsel %vm28_vm0, %v185_v3, 0  ;;  %v184_v5 = vld [vmem:[%s278_s0] sm:$0xff] }
   0x3   :  { %70 = vmatpush.bf16.xpose.msra.mxu0 %v62_v2  ;;  %v188_v10 = vld [vmem:[%s280_s3] sm:$0xff]  }
   0x4   :  { %v193_v11 = vld [vmem:[%s279_s2] ss:$0 sm:$0xff]  ;;  %v189_v14 = vunpack.c.l.bf16 %v188_v10  ;;  %v190_v19 = vunpack.c.h.bf16 %v188_v10 }
   0x5   :  { %v194_v55 = vld [vmem:[%s281_s4] ss:$0 sm:$0xff] }
   0x6   :  { %v195_v58 = vld [vmem:[%s282_s5] ss:$0 sm:$0xff] }
   0x7   :  { %v197_v25 = vpop.eup %196 }
   0x8   :  { %v31_v6 = vld [vmem:[#allocation2] sm:$0xff]  ;;  %v106_v26 = vmul.f32 32.0, %v197_v25  ;;  %vm110_vm1 = vweird.f32 %v197_v25 }
   0x9   :  { %v32_v9 = vld [vmem:[#allocation2 + $0x8] sm:$0xff] }
   0xa   :  { %v107_v27 = vsub.f32 1.0, %v106_v26 }
   0xb   :  { %71 = vmatpush.bf16.xpose.msra.mxu0 %v59_v4 }
   0xc   :  { %v108_v28 = vmul.f32 %v197_v25, %v107_v27 }
   0xe   :  { %v109_v29 = vadd.f32 %v197_v25, %v108_v28 }
  0x10   :  { %v111_v30 = vsel %vm110_vm1, %v197_v25, %v109_v29 }
  0x12   :  { %183 = vmatmul.msk.bf16.vlgmr.msra.gmra.mxu0 %vm28_vm0, %v184_v5 }
  0x8f   :  { %v73_v7 = vpop.f32.mrf.mxu0 }
  0x90   :  { %v78_v8 = vadd.f32 %v73_v7, %v31_v6 }
  0x92   :  { %80 = vst.msk [vmem:[#allocation2] sm:$0xff] %vm28_vm0, %v78_v8 }
  0x97   :  { %v75_v12 = vpop.f32.mrf.mxu0 }
  0x98   :  { %v79_v13 = vadd.f32 %v75_v12, %v32_v9 }
  0x99   :  { %v85_v15 = vld [vmem:[#allocation2] sm:$0xff] }
  0x9a   :  { %81 = vst.msk [vmem:[#allocation2 + $0x8] sm:$0xff] %vm28_vm0, %v79_v13  ;;  %v91_v16 = vadd.f32 %v193_v11, %v85_v15 }
  0x9c   :  { %v97_v17 = vadd.f32 %v189_v14, %v91_v16 }
  0x9e   :  { %v99_v18 = vsel %vm28_vm0, %v97_v17, 0.0 }
  0x9f   :  { %100 = vadd.xlane.f32.xlu0 %v99_v18 }
  0xa1   :  { %v86_v20 = vld [vmem:[#allocation2 + $0x8] sm:$0xff] }
  0xa2   :  { %v92_v21 = vadd.f32 %v193_v11, %v86_v20 }
  0xa4   :  { %v98_v22 = vadd.f32 %v190_v19, %v92_v21 }
  0xa6   :  { %v102_v23 = vsel %vm28_vm0, %v98_v22, 0.0 }
  0xa7   :  { %103 = vadd.xlane.f32.xlu0 %v102_v23 }
 0x112   :  { %v101_v31 = vpop.xlane.xlu0 %100 }
 0x113   :  { %v112_v32 = vmul.f32 %v111_v30, %v101_v31 }
 0x115   :  { %v114_v33 = vsub.f32 %v97_v17, %v112_v32 }
 0x117   :  { %v116_v34 = vmul.f32 %v114_v33, %v114_v33 }
 0x119   :  { %v118_v35 = vsel %vm28_vm0, %v116_v34, 0.0 }
 0x11a   :  { %119 = vadd.xlane.f32.xlu1 %v118_v35  ;;  %v104_v36 = vpop.xlane.xlu0 %103 }
 0x11b   :  { %v113_v37 = vmul.f32 %v111_v30, %v104_v36 }
 0x11d   :  { %v115_v38 = vsub.f32 %v98_v22, %v113_v37 }
 0x11f   :  { %v117_v39 = vmul.f32 %v115_v38, %v115_v38 }
 0x121   :  { %v121_v40 = vsel %vm28_vm0, %v117_v39, 0.0 }
 0x122   :  { %122 = vadd.xlane.f32.xlu1 %v121_v40 }
 0x18d   :  { %v120_v41 = vpop.xlane.xlu1 %119 }
 0x18e   :  { %v124_v42 = vmul.f32 %v120_v41, %v111_v30 }
 0x190   :  { %v126_v43 = vadd.f32 1e-05, %v124_v42 }
 0x192   :  { %198 = vrsqrt.f32 %v126_v43  ;;  %vm134_vm3 = vweird.f32 %v126_v43 }
 0x195   :  { %v123_v44 = vpop.xlane.xlu1 %122 }
 0x196   :  { %v125_v45 = vmul.f32 %v123_v44, %v111_v30 }
 0x198   :  { %v199_v46 = vpop.eup %198  ;;  %v127_v47 = vadd.f32 1e-05, %v125_v45 }
 0x199   :  { %v129_v48 = vmul.f32 %v199_v46, %v126_v43  ;;  %vm135_vm2 = vweird.f32 %v199_v46 }
 0x19a   :  { %200 = vrsqrt.f32 %v127_v47  ;;  %vm136_vm4 = vmor %vm134_vm3, %vm135_vm2  ;;  %vm144_vm7 = vweird.f32 %v127_v47 }
 0x19b   :  { %v130_v49 = vmul.f32 %v199_v46, %v129_v48 }
 0x19d   :  { %v131_v50 = vmul.f32 0.5, %v130_v49 }
 0x19f   :  { %v132_v51 = vsub.f32 1.5, %v131_v50 }
 0x1a0   :  { %v201_v52 = vpop.eup %200 }
 0x1a1   :  { %v133_v53 = vmul.f32 %v199_v46, %v132_v51  ;;  %v139_v54 = vmul.f32 %v201_v52, %v127_v47  ;;  %vm145_vm5 = vweird.f32 %v201_v52 }
 0x1a2   :  { %vm146_vm8 = vmor %vm144_vm7, %vm145_vm5 }
 0x1a3   :  { %v137_v56 = vsel %vm136_vm4, %v199_v46, %v133_v53  ;;  %v140_v57 = vmul.f32 %v201_v52, %v139_v54 }
 0x1a4   :  { %v148_v59 = vmul.f32 %v137_v56, %v114_v33 }
 0x1a5   :  { %v141_v60 = vmul.f32 0.5, %v140_v57 }
 0x1a6   :  { %v154_v61 = vmul.f32 %v194_v55, %v148_v59 }
 0x1a7   :  { %v142_v62 = vsub.f32 1.5, %v141_v60 }
 0x1a8   :  { %v160_v63 = vadd.f32 %v195_v58, %v154_v61 }
 0x1a9   :  { %v143_v0 = vmul.f32 %v201_v52, %v142_v62 }
 0x1aa   :  { %v162_v1 = vpack.c.bf16 %v160_v63, %v160_v63 }
 0x1ab   :  { %v147_v2 = vsel %vm146_vm8, %v201_v52, %v143_v0 }
 0x1ac   :  { %165 = vst.msk [vmem:[%s283_s6] sm:$0xf] %vm164_vm6, %v162_v1  ;;  %v149_v3 = vmul.f32 %v147_v2, %v115_v38 }
 0x1ae   :  { %v155_v4 = vmul.f32 %v194_v55, %v149_v3 }
 0x1b0   :  { %v161_v5 = vadd.f32 %v195_v58, %v155_v4 }
 0x1b2   :  { %v163_v6 = vpack.c.bf16 %v161_v5, %v161_v5 }
 0x1b4   :  { %166 = vst.msk [vmem:[%s283_s6 + $0x4] sm:$0xf] %vm164_vm6, %v163_v6 }

// kernel: bert_forward.15
= control target key start
LH: loop header
LB: loop body
LE: loop exit
PB: predicated region body
PF: predicated region fallthrough
CT: control target
= control target key end

     0   :  { %s676_s18 = smov 0   ;;  %s678_s19 = smov 0   ;;  %s741_s0 = inlined_call_operand.vmem [shape: bf16[2,8,32], index: 0, kind: input, shape index: {}]   ;;  %s742_s1 = inlined_call_operand.vmem [shape: bf16[2,8,32], index: 1, kind: input, shape index: {}]   ;;  %s743_s2 = inlined_call_operand.vmem [shape: bf16[2,8,32], index: 2, kind: input, shape index: {}]   ;;  %s744_s3 = inlined_call_operand.vmem [shape: f32[8,8], index: 3, kind: input, shape index: {}]   ;;  %s745_s4 = inlined_call_operand.vmem [shape: f32[2,1,8], index: 4, kind: input, shape index: {}]   ;;  %s746_s5 = inlined_call_operand.vmem [shape: bf16[2,8,32], index: 5, kind: output, shape index: {}]  }
   0x1   :  { %s680_s20 = smov 0  }
   0x2 LB: > { %s27_s21 = sadd.s32 1, %s638_s19  ;;  %p574_p0 = scmp.ge.s32.totalorder %s642_s20, 1  ;;  %s642_s20 = sphi %s680_s20, %s15_s20   ;;  %s638_s19 = sphi %s678_s19, %s748_s19   ;;  %s634_s18 = sphi %s676_s18, %s747_s18  }
   0x3   : > { %p29_p1 = scmp.ge.s32.totalorder %s27_s21, 2  ;;  %p241_p2 = scmp.lt.s32.totalorder %s642_s20, 3 }
   0x5   : > { %s750_s21 = smov (%p29_p1, %s27_s21), 0  ;;  %p242_p3 = pnand %p574_p0, %p241_p2 }
   0x6   : > { %p290_p4 = scmp.lt.s32.totalorder (!%p242_p3), %s634_s18, 1  ;;  %s644_s7 = smov (!%p242_p3), 112  }
   0x7   : > { %245 = sbr.rel (%p242_p3) target bundleno = 785 (0x311), region = 40  ;;  %s645_s13 = smov (!%p242_p3), 16  }
   0xc   : > { %s752_s18 = smov (!%p290_p4, %s634_s18), 1  ;;  %vm331_vm0 = vcmask 130048   ;;  %v322_v13 = vld [vmem:[%s744_s3] sm:$0xff]  ;;  %vm351_vm1 = vcmask 64512   ;;  %vm367_vm2 = vcmask 1043456   ;;  %vm455_vm3 = vcmask 257024  }
   0xd   : > { %s694_s22 = sshll.u32 %s752_s18, 2  ;;  %s313_s6 = scalar_lea.vmem %s745_s4, %s752_s18 }
   0xe   : > { %s303_s25 = scalar_lea.vmem %s742_s1, %s694_s22  ;;  %s296_s28 = scalar_lea.vmem %s741_s0, %s694_s22  ;;  %v611_v12 = vld [vmem:[%s313_s6] ss:$0 sm:$0xff] }
   0xf   : > { %v329_v0 = vld [vmem:[%s303_s25] sm:$0xf]  ;;  %v327_v14 = vadd.f32 %v611_v12, %v322_v13  ;;  %s310_s12 = scalar_lea.vmem %s743_s2, %s694_s22  ;;  %s320_s16 = scalar_lea.vmem %s746_s5, %s694_s22 }
  0x10   : > { %v390_v1 = vunpack.c.l.b16 %v329_v0  ;;  %v328_v2 = vld [vmem:[%s296_s28] sm:$0xf]  ;;  %v336_v6 = vsel %vm331_vm0, %v329_v0, 0 }
  0x11   : > { %v385_v4 = vunpack.c.l.b16 %v328_v2  ;;  %345 = vmatpush.bf16.xpose.msra.mxu0 %v336_v6  ;;  %v330_v31 = vld [vmem:[%s310_s12] sm:$0xf] }
  0x12   : > { %v391_v3 = vpack.c.b16 %v390_v1, %v390_v1  ;;  %v426_v32 = vunpack.c.l.b16 %v330_v31  ;;  %v369_v34 = vsel %vm367_vm2, %v330_v31, 0 }
  0x13   : > { %v386_v5 = vpack.c.b16 %v385_v4, %v385_v4  ;;  %378 = vmatpush.bf16.msra.mxu1 %v369_v34 }
  0x14   : > { %392 = vrot.lane.b32.xlu0 %v391_v3, %s644_s7  ;;  %v427_v33 = vpack.c.b16 %v426_v32, %v426_v32 }
  0x18   : > { %579 = vmatmul.msk.bf16.vlgmr.msra.gmra.mxu0 %vm331_vm0, %v328_v2 }
  0x1c   : > { %387 = vrot.lane.b32.xlu0 %v386_v5, %s644_s7 }
  0x86   : > { %v393_v7 = vpop.permute.xlu0 %392 }
  0x87   : > { %v398_v8 = vsel %vm331_vm0, %v393_v7, 0 }
  0x88   : > { %407 = vmatpush.bf16.xpose.msra.mxu2 %v398_v8 }
  0x8e   : > { %v388_v9 = vpop.permute.xlu0 %387 }
  0x8f   : > { %581 = vmatmul.msk.bf16.vlgmr.msra.gmra.mxu2 %vm331_vm0, %v388_v9 }
  0x95   : > { %v347_v10 = vpop.f32.mrf.mxu0 }
  0x96   : > { %v348_v18 = vadd.f32 %v347_v10, %v327_v14 }
  0x98   : > { %v352_v20 = vsel %vm351_vm1, %v348_v18, -inf }
  0x9d   : > { %v349_v11 = vpop.f32.mrf.mxu0 }
 0x112   : > { %v409_v15 = vpop.f32.mrf.mxu2 }
 0x113   : > { %v410_v16 = vadd.f32 %v409_v15, %v327_v14 }
 0x115   : > { %v413_v17 = vsel %vm351_vm1, %v410_v16, -inf }
 0x116   : > { %414 = vmax.xlane.f32.xlu1 %v413_v17 }
 0x11a   : > { %v411_v19 = vpop.f32.mrf.mxu2 }
 0x11e   : > { %353 = vmax.xlane.f32.xlu1 %v352_v20 }
 0x189   : > { %v415_v21 = vpop.xlane.xlu1 %414 }
 0x18a   : > { %v416_v22 = vsub.f32 %v410_v16, %v415_v21 }
 0x18c   : > { %v417_v23 = vmul.f32 1.442695, %v416_v22 }
 0x18e   : > { %612 = vpow2.f32 %v417_v23 }
 0x191   : > { %v354_v24 = vpop.xlane.xlu1 %353 }
 0x192   : > { %v355_v25 = vsub.f32 %v348_v18, %v354_v24 }
 0x194   : > { %v613_v26 = vpop.eup %612  ;;  %v356_v27 = vmul.f32 1.442695, %v355_v25 }
 0x195   : > { %v419_v28 = vsel %vm351_vm1, %v613_v26, 0.0 }
 0x196   : > { %614 = vpow2.f32 %v356_v27  ;;  %420 = vadd.xlane.f32.xlu2 %v419_v28 }
 0x19c   : > { %v615_v29 = vpop.eup %614 }
 0x19d   : > { %v358_v30 = vsel %vm351_vm1, %v615_v29, 0.0 }
 0x19e   : > { %359 = vadd.xlane.f32.xlu0 %v358_v30 }
 0x1ae   : > { %428 = vrot.lane.b32.xlu2 %v427_v33, %s644_s7 }
 0x209   : > { %v421_v35 = vpop.xlane.xlu2 %420 }
 0x20a   : > { %616 = vrcp.f32 %v421_v35 }
 0x210   : > { %v617_v36 = vpop.eup %616 }
 0x211   : > { %v429_v37 = vpop.permute.xlu2 %428  ;;  %v360_v38 = vpop.xlane.xlu0 %359  ;;  %v423_v39 = vmul.f32 %v617_v36, %v613_v26 }
 0x212   : > { %618 = vrcp.f32 %v360_v38  ;;  %v434_v40 = vsel %vm367_vm2, %v429_v37, 0 }
 0x213   : > { %443 = vmatpush.bf16.msra.mxu3 %v434_v40  ;;  %v424_v41 = vpack.c.bf16 %v423_v39, %v423_v39 }
 0x216   : > { %582 = vmatmul.msk.bf16.vlgmr.msra.gmra.mxu3 %vm351_vm1, %v424_v41 }
 0x218   : > { %v619_v42 = vpop.eup %618 }
 0x219   : > { %v362_v43 = vmul.f32 %v619_v42, %v615_v29 }
 0x21b   : > { %v363_v44 = vpack.c.bf16 %v362_v43, %v362_v43 }
 0x21d   : > { %580 = vmatmul.msk.bf16.vlgmr.msra.gmra.mxu1 %vm351_vm1, %v363_v44 }
 0x299   : > { %v445_v45 = vpop.f32.mrf.mxu3 }
 0x29a   : > { %450 = vrot.lane.b32.xlu1 %v445_v45, %s645_s13  ;;  %v380_v46 = vpop.f32.mrf.mxu1 }
 0x2a1   : > { %v447_v47 = vpop.f32.mrf.mxu3 }
 0x2a2   : > { %v382_v48 = vpop.f32.mrf.mxu1 }
 0x30c   : > { %v451_v49 = vpop.permute.xlu1 %450 }
 0x30d   : > { %v453_v50 = vsel %vm331_vm0, %v380_v46, %v451_v49 }
 0x30e   : > { %v454_v51 = vpack.c.bf16 %v453_v50, %v453_v50 }
 0x310   : > { %456 = vst.msk [vmem:[%s320_s16] sm:$0xf] %vm455_vm3, %v454_v51 }
 0x311 PF: > { %s15_s20 = sadd.s32 1, %s642_s20   ;;  %s747_s18 = smov %s638_s19 }
 0x312   : > { %p12_p5 = scmp.ge.s32.totalorder %s15_s20, 4   ;;  %s748_s19 = smov %s750_s21 }
 0x314   :  { %14 = sbr.rel (!%p12_p5) target bundleno = 2 (0x2), region = 79 }

// kernel: bert_forward.14
= control target key start
LH: loop header
LB: loop body
LE: loop exit
PB: predicated region body
PF: predicated region fallthrough
CT: control target
= control target key end

     0   :  { %vm73_vm0 = vcmask 261120   ;;  %vm19_vm1 = vcmask 785408   ;;  %v172_v6 = vmov 0.0   ;;  %vm127_vm2 = vcmask 781312   ;;  %s234_s1 = inlined_call_operand.vmem [shape: bf16[96,32], index: 1, kind: input, shape index: {}]   ;;  %s235_s2 = inlined_call_operand.vmem [shape: f32[1,96], index: 2, kind: input, shape index: {}]   ;;  %s236_s0 = inlined_call_operand.vmem [shape: bf16[16,32], index: 0, kind: input, shape index: {}]   ;;  %s237_s3 = inlined_call_operand.vmem [shape: bf16[16,96], index: 3, kind: output, shape index: {}]  }
   0x1   :  { %v169_v0 = vld [vmem:[%s234_s1 + $0x28] sm:$0xff]  ;;  %v168_v2 = vld [vmem:[%s234_s1 + $0x20] sm:$0xff]  ;;  %v167_v4 = vld [vmem:[%s234_s1 + $0x18] sm:$0xff]  ;;  %20 = vst.msk [vmem:[#allocation2] sm:$0xff] %vm19_vm1, %v172_v6 }
   0x2   :  { %v93_v1 = vsel %vm73_vm0, %v169_v0, 0  ;;  %v90_v3 = vsel %vm73_vm0, %v168_v2, 0  ;;  %v87_v5 = vsel %vm73_vm0, %v167_v4, 0  ;;  %v166_v7 = vld [vmem:[%s234_s1 + $0x10] sm:$0xff]  ;;  %21 = vst.msk [vmem:[#allocation2 + $0x8] sm:$0xff] %vm19_vm1, %v172_v6  ;;  %v165_v9 = vld [vmem:[%s234_s1 + $0x8] sm:$0xff] }
   0x3   :  { %97 = vmatpush.bf16.xpose.msra.mxu0 %v93_v1  ;;  %v84_v8 = vsel %vm73_vm0, %v166_v7, 0  ;;  %v81_v10 = vsel %vm73_vm0, %v165_v9, 0  ;;  %v164_v11 = vld [vmem:[%s234_s1] sm:$0xff] }
   0x4   :  { %v78_v12 = vsel %vm73_vm0, %v164_v11, 0  ;;  %v163_v13 = vld [vmem:[%s236_s0] sm:$0xff] }
   0x5   :  { %v171_v18 = vld [vmem:[%s235_s2] ss:$0 sm:$0xff] }
   0x8   :  { %v22_v14 = vld [vmem:[#allocation2] sm:$0xff] }
   0x9   :  { %v23_v17 = vld [vmem:[#allocation2 + $0x8] sm:$0xff] }
   0xb   :  { %98 = vmatpush.bf16.xpose.msra.mxu0 %v90_v3 }
  0x13   :  { %99 = vmatpush.bf16.xpose.msra.mxu0 %v87_v5 }
  0x1b   :  { %100 = vmatpush.bf16.xpose.msra.mxu0 %v84_v8 }
  0x23   :  { %101 = vmatpush.bf16.xpose.msra.mxu0 %v81_v10 }
  0x2b   :  { %102 = vmatpush.bf16.xpose.msra.mxu0 %v78_v12 }
  0x32   :  { %162 = vmatmul.msk.bf16.vlgmr.msra.gmra.mxu0 %vm73_vm0, %v163_v13 }
  0xaf   :  { %v104_v15 = vpop.f32.mrf.mxu0 }
  0xb0   :  { %v109_v16 = vadd.f32 %v104_v15, %v22_v14 }
  0xb2   :  { %112 = vst.msk [vmem:[#allocation2] sm:$0xff] %vm19_vm1, %v109_v16 }
  0xb7   :  { %v106_v19 = vpop.f32.mrf.mxu0 }
  0xb8   :  { %v110_v20 = vadd.f32 %v106_v19, %v23_v17 }
  0xb9   :  { %v117_v21 = vld [vmem:[#allocation2] sm:$0xff] }
  0xba   :  { %v123_v22 = vadd.f32 %v171_v18, %v117_v21  ;;  %113 = vst.msk [vmem:[#allocation2 + $0x8] sm:$0xff] %vm19_vm1, %v110_v20 }
  0xbc   :  { %v125_v23 = vpack.c.bf16 %v123_v22, %v123_v22 }
  0xbe   :  { %128 = vst.msk [vmem:[%s237_s3] sm:$0xf] %vm127_vm2, %v125_v23 }
  0xc1   :  { %v118_v24 = vld [vmem:[#allocation2 + $0x8] sm:$0xff] }
  0xc2   :  { %v124_v25 = vadd.f32 %v171_v18, %v118_v24 }
  0xc4   :  { %v126_v26 = vpack.c.bf16 %v124_v25, %v124_v25 }
  0xc6   :  { %129 = vst.msk [vmem:[%s237_s3 + $0x4] sm:$0xf] %vm127_vm2, %v126_v26 }

// kernel: bert_forward.17
= control target key start
LH: loop header
LB: loop body
LE: loop exit
PB: predicated region body
PF: predicated region fallthrough
CT: control target
= control target key end

     0   :  { %vm59_vm0 = vcmask 261120   ;;  %vm19_vm1 = vcmask 523264   ;;  %v144_v3 = vmov 0.0   ;;  %vm109_vm2 = vcmask 519168   ;;  %s198_s1 = inlined_call_operand.vmem [shape: bf16[64,32], index: 1, kind: input, shape index: {}]   ;;  %s199_s2 = inlined_call_operand.vmem [shape: f32[1,64], index: 2, kind: input, shape index: {}]   ;;  %s200_s0 = inlined_call_operand.vmem [shape: bf16[16,32], index: 0, kind: input, shape index: {}]   ;;  %s201_s3 = inlined_call_operand.vmem [shape: bf16[16,64], index: 3, kind: output, shape index: {}]  }
   0x1   :  { %v141_v0 = vld [vmem:[%s198_s1 + $0x18] sm:$0xff]  ;;  %v140_v2 = vld [vmem:[%s198_s1 + $0x10] sm:$0xff]  ;;  %20 = vst.msk [vmem:[#allocation2] sm:$0xff] %vm19_vm1, %v144_v3  ;;  %v139_v5 = vld [vmem:[%s198_s1 + $0x8] sm:$0xff] }
   0x2   :  { %v73_v1 = vsel %vm59_vm0, %v141_v0, 0  ;;  %21 = vst.msk [vmem:[#allocation2 + $0x8] sm:$0xff] %vm19_vm1, %v144_v3  ;;  %v70_v4 = vsel %vm59_vm0, %v140_v2, 0  ;;  %v67_v6 = vsel %vm59_vm0, %v139_v5, 0  ;;  %v138_v7 = vld [vmem:[%s198_s1] sm:$0xff] }
   0x3   :  { %79 = vmatpush.bf16.xpose.msra.mxu0 %v73_v1  ;;  %v64_v8 = vsel %vm59_vm0, %v138_v7, 0  ;;  %v137_v9 = vld [vmem:[%s200_s0] sm:$0xff] }
   0x4   :  { %v143_v14 = vld [vmem:[%s199_s2] ss:$0 sm:$0xff] }
   0x8   :  { %v22_v10 = vld [vmem:[#allocation2] sm:$0xff] }
   0x9   :  { %v23_v13 = vld [vmem:[#allocation2 + $0x8] sm:$0xff] }
   0xb   :  { %80 = vmatpush.bf16.xpose.msra.mxu0 %v70_v4 }
  0x13   :  { %81 = vmatpush.bf16.xpose.msra.mxu0 %v67_v6 }
  0x1b   :  { %82 = vmatpush.bf16.xpose.msra.mxu0 %v64_v8 }
  0x22   :  { %136 = vmatmul.msk.bf16.vlgmr.msra.gmra.mxu0 %vm59_vm0, %v137_v9 }
  0x9f   :  { %v84_v11 = vpop.f32.mrf.mxu0 }
  0xa0   :  { %v89_v12 = vadd.f32 %v84_v11, %v22_v10 }
  0xa2   :  { %92 = vst.msk [vmem:[#allocation2] sm:$0xff] %vm19_vm1, %v89_v12 }
  0xa7   :  { %v86_v15 = vpop.f32.mrf.mxu0 }
  0xa8   :  { %v90_v16 = vadd.f32 %v86_v15, %v23_v13 }
  0xa9   :  { %v97_v17 = vld [vmem:[#allocation2] sm:$0xff] }
  0xaa   :  { %v103_v18 = vadd.f32 %v143_v14, %v97_v17  ;;  %93 = vst.msk [vmem:[#allocation2 + $0x8] sm:$0xff] %vm19_vm1, %v90_v16 }
  0xac   :  { %v105_v19 = vmax.f32 %v103_v18, 0.0 }
  0xae   :  { %v107_v20 = vpack.c.bf16 %v105_v19, %v105_v19 }
  0xb0   :  { %110 = vst.msk [vmem:[%s201_s3] sm:$0xf] %vm109_vm2, %v107_v20 }
  0xb1   :  { %v98_v21 = vld [vmem:[#allocation2 + $0x8] sm:$0xff] }
  0xb2   :  { %v104_v22 = vadd.f32 %v143_v14, %v98_v21 }
  0xb4   :  { %v106_v23 = vmax.f32 %v104_v22, 0.0 }
  0xb6   :  { %v108_v24 = vpack.c.bf16 %v106_v23, %v106_v23 }
  0xb8   :  { %111 = vst.msk [vmem:[%s201_s3 + $0x4] sm:$0xf] %vm109_vm2, %v108_v24 }

// kernel: bert_forward.18
= control target key start
LH: loop header
LB: loop body
LE: loop exit
PB: predicated region body
PF: predicated region fallthrough
CT: control target
= control target key end

     0   :  { %vm54_vm0 = vcmask 523264   ;;  %vm28_vm1 = vcmask 261120   ;;  %v203_v1 = vmov 0.0   ;;  %v204_v24 = vmov 32.0   ;;  %s275_s1 = inlined_call_operand.vmem [shape: bf16[32,64], index: 1, kind: input, shape index: {}]   ;;  %s276_s0 = inlined_call_operand.vmem [shape: bf16[16,64], index: 0, kind: input, shape index: {}]   ;;  %s277_s2 = inlined_call_operand.vmem [shape: f32[1,32], index: 2, kind: input, shape index: {}]   ;;  %s278_s3 = inlined_call_operand.vmem [shape: bf16[16,32], index: 3, kind: input, shape index: {}]   ;;  %s279_s4 = inlined_call_operand.vmem [shape: f32[1,32], index: 4, kind: input, shape index: {}]   ;;  %s280_s5 = inlined_call_operand.vmem [shape: f32[1,32], index: 5, kind: input, shape index: {}]   ;;  %s281_s6 = inlined_call_operand.vmem [shape: bf16[16,32], index: 6, kind: output, shape index: {}]  }
   0x1   :  { %v187_v0 = vld [vmem:[%s275_s1 + $0x8] sm:$0xff]  ;;  %29 = vst.msk [vmem:[#allocation2] sm:$0xff] %vm28_vm1, %v203_v1  ;;  %v186_v3 = vld [vmem:[%s275_s1] sm:$0xff]  ;;  %197 = vrcp.f32 %v204_v24  ;;  %vm165_vm7 = vcmask 257024  }
   0x2   :  { %30 = vst.msk [vmem:[#allocation2 + $0x8] sm:$0xff] %vm28_vm1, %v203_v1  ;;  %v62_v2 = vsel %vm54_vm0, %v187_v0, 0  ;;  %v59_v4 = vsel %vm54_vm0, %v186_v3, 0  ;;  %v185_v5 = vld [vmem:[%s276_s0] sm:$0xff] }
   0x3   :  { %70 = vmatpush.bf16.xpose.msra.mxu0 %v62_v2  ;;  %v189_v10 = vld [vmem:[%s278_s3] sm:$0xff]  }
   0x4   :  { %v194_v11 = vld [vmem:[%s277_s2] ss:$0 sm:$0xff]  ;;  %v190_v14 = vunpack.c.l.bf16 %v189_v10  ;;  %v191_v19 = vunpack.c.h.bf16 %v189_v10 }
   0x5   :  { %v195_v55 = vld [vmem:[%s279_s4] ss:$0 sm:$0xff] }
   0x6   :  { %v196_v58 = vld [vmem:[%s280_s5] ss:$0 sm:$0xff] }
   0x7   :  { %v198_v25 = vpop.eup %197 }
   0x8   :  { %v31_v6 = vld [vmem:[#allocation2] sm:$0xff]  ;;  %v107_v26 = vmul.f32 32.0, %v198_v25  ;;  %vm111_vm2 = vweird.f32 %v198_v25 }
   0x9   :  { %v32_v9 = vld [vmem:[#allocation2 + $0x8] sm:$0xff] }
   0xa   :  { %v108_v27 = vsub.f32 1.0, %v107_v26 }
   0xb   :  { %71 = vmatpush.bf16.xpose.msra.mxu0 %v59_v4 }
   0xc   :  { %v109_v28 = vmul.f32 %v198_v25, %v108_v27 }
   0xe   :  { %v110_v29 = vadd.f32 %v198_v25, %v109_v28 }
  0x10   :  { %v112_v30 = vsel %vm111_vm2, %v198_v25, %v110_v29 }
  0x12   :  { %184 = vmatmul.msk.bf16.vlgmr.msra.gmra.mxu0 %vm54_vm0, %v185_v5 }
  0x8f   :  { %v73_v7 = vpop.f32.mrf.mxu0 }
  0x90   :  { %v78_v8 = vadd.f32 %v73_v7, %v31_v6 }
  0x92   :  { %81 = vst.msk [vmem:[#allocation2] sm:$0xff] %vm28_vm1, %v78_v8 }
  0x97   :  { %v75_v12 = vpop.f32.mrf.mxu0 }
  0x98   :  { %v79_v13 = vadd.f32 %v75_v12, %v32_v9 }
  0x99   :  { %v86_v15 = vld [vmem:[#allocation2] sm:$0xff] }
  0x9a   :  { %82 = vst.msk [vmem:[#allocation2 + $0x8] sm:$0xff] %vm28_vm1, %v79_v13  ;;  %v92_v16 = vadd.f32 %v194_v11, %v86_v15 }
  0x9c   :  { %v98_v17 = vadd.f32 %v190_v14, %v92_v16 }
  0x9e   :  { %v100_v18 = vsel %vm28_vm1, %v98_v17, 0.0 }
  0x9f   :  { %101 = vadd.xlane.f32.xlu0 %v100_v18 }
  0xa1   :  { %v87_v20 = vld [vmem:[#allocation2 + $0x8] sm:$0xff] }
  0xa2   :  { %v93_v21 = vadd.f32 %v194_v11, %v87_v20 }
  0xa4   :  { %v99_v22 = vadd.f32 %v191_v19, %v93_v21 }
  0xa6   :  { %v103_v23 = vsel %vm28_vm1, %v99_v22, 0.0 }
  0xa7   :  { %104 = vadd.xlane.f32.xlu0 %v103_v23 }
 0x112   :  { %v102_v31 = vpop.xlane.xlu0 %101 }
 0x113   :  { %v113_v32 = vmul.f32 %v112_v30, %v102_v31 }
 0x115   :  { %v115_v33 = vsub.f32 %v98_v17, %v113_v32 }
 0x117   :  { %v117_v34 = vmul.f32 %v115_v33, %v115_v33 }
 0x119   :  { %v119_v35 = vsel %vm28_vm1, %v117_v34, 0.0 }
 0x11a   :  { %120 = vadd.xlane.f32.xlu1 %v119_v35  ;;  %v105_v36 = vpop.xlane.xlu0 %104 }
 0x11b   :  { %v114_v37 = vmul.f32 %v112_v30, %v105_v36 }
 0x11d   :  { %v116_v38 = vsub.f32 %v99_v22, %v114_v37 }
 0x11f   :  { %v118_v39 = vmul.f32 %v116_v38, %v116_v38 }
 0x121   :  { %v122_v40 = vsel %vm28_vm1, %v118_v39, 0.0 }
 0x122   :  { %123 = vadd.xlane.f32.xlu1 %v122_v40 }
 0x18d   :  { %v121_v41 = vpop.xlane.xlu1 %120 }
 0x18e   :  { %v125_v42 = vmul.f32 %v121_v41, %v112_v30 }
 0x190   :  { %v127_v43 = vadd.f32 1e-05, %v125_v42 }
 0x192   :  { %199 = vrsqrt.f32 %v127_v43  ;;  %vm135_vm4 = vweird.f32 %v127_v43 }
 0x195   :  { %v124_v44 = vpop.xlane.xlu1 %123 }
 0x196   :  { %v126_v45 = vmul.f32 %v124_v44, %v112_v30 }
 0x198   :  { %v200_v46 = vpop.eup %199  ;;  %v128_v47 = vadd.f32 1e-05, %v126_v45 }
 0x199   :  { %v130_v48 = vmul.f32 %v200_v46, %v127_v43  ;;  %vm136_vm3 = vweird.f32 %v200_v46 }
 0x19a   :  { %201 = vrsqrt.f32 %v128_v47  ;;  %vm137_vm5 = vmor %vm135_vm4, %vm136_vm3  ;;  %vm145_vm8 = vweird.f32 %v128_v47 }
 0x19b   :  { %v131_v49 = vmul.f32 %v200_v46, %v130_v48 }
 0x19d   :  { %v132_v50 = vmul.f32 0.5, %v131_v49 }
 0x19f   :  { %v133_v51 = vsub.f32 1.5, %v132_v50 }
 0x1a0   :  { %v202_v52 = vpop.eup %201 }
 0x1a1   :  { %v134_v53 = vmul.f32 %v200_v46, %v133_v51  ;;  %v140_v54 = vmul.f32 %v202_v52, %v128_v47  ;;  %vm146_vm6 = vweird.f32 %v202_v52 }
 0x1a2   :  { %vm147_vm9 = vmor %vm145_vm8, %vm146_vm6 }
 0x1a3   :  { %v138_v56 = vsel %vm137_vm5, %v200_v46, %v134_v53  ;;  %v141_v57 = vmul.f32 %v202_v52, %v140_v54 }
 0x1a4   :  { %v149_v59 = vmul.f32 %v138_v56, %v115_v33 }
 0x1a5   :  { %v142_v60 = vmul.f32 0.5, %v141_v57 }
 0x1a6   :  { %v155_v61 = vmul.f32 %v195_v55, %v149_v59 }
 0x1a7   :  { %v143_v62 = vsub.f32 1.5, %v142_v60 }
 0x1a8   :  { %v161_v63 = vadd.f32 %v196_v58, %v155_v61 }
 0x1a9   :  { %v144_v0 = vmul.f32 %v202_v52, %v143_v62 }
 0x1aa   :  { %v163_v1 = vpack.c.bf16 %v161_v63, %v161_v63 }
 0x1ab   :  { %v148_v2 = vsel %vm147_vm9, %v202_v52, %v144_v0 }
 0x1ac   :  { %166 = vst.msk [vmem:[%s281_s6] sm:$0xf] %vm165_vm7, %v163_v1  ;;  %v150_v3 = vmul.f32 %v148_v2, %v116_v38 }
 0x1ae   :  { %v156_v4 = vmul.f32 %v195_v55, %v150_v3 }
 0x1b0   :  { %v162_v5 = vadd.f32 %v196_v58, %v156_v4 }
 0x1b2   :  { %v164_v6 = vpack.c.bf16 %v162_v5, %v162_v5 }
 0x1b4   :  { %167 = vst.msk [vmem:[%s281_s6 + $0x4] sm:$0xf] %vm165_vm7, %v164_v6 }

// kernel: bert_forward.24
= control target key start
LH: loop header
LB: loop body
LE: loop exit
PB: predicated region body
PF: predicated region fallthrough
CT: control target
= control target key end

     0   :  { %vm43_vm0 = vcmask 261120   ;;  %vm25_vm1 = vcmask 259072   ;;  %v145_v1 = vmov 0.0   ;;  %v146_v15 = vmov 32.0   ;;  %s202_s1 = inlined_call_operand.vmem [shape: bf16[32,32], index: 1, kind: input, shape index: {}]   ;;  %s203_s0 = inlined_call_operand.vmem [shape: bf16[6,32], index: 0, kind: input, shape index: {}]   ;;  %s204_s2 = inlined_call_operand.vmem [shape: f32[1,32], index: 2, kind: input, shape index: {}]   ;;  %s205_s3 = inlined_call_operand.vmem [shape: f32[1,32], index: 3, kind: input, shape index: {}]   ;;  %s206_s4 = inlined_call_operand.vmem [shape: f32[1,32], index: 4, kind: input, shape index: {}]   ;;  %s207_s5 = inlined_call_operand.vmem [shape: bf16[6,32], index: 5, kind: output, shape index: {}]  }
   0x1   :  { %v135_v0 = vld [vmem:[%s202_s1 + $0x8] sm:$0xff]  ;;  %26 = vst.msk [vmem:[#allocation2] sm:$0x3f] %vm25_vm1, %v145_v1  ;;  %v134_v3 = vld [vmem:[%s202_s1] sm:$0xff]  ;;  %141 = vrcp.f32 %v146_v15  ;;  %vm119_vm6 = vcmask 256000  }
   0x2   :  { %v51_v2 = vsel %vm43_vm0, %v135_v0, 0  ;;  %v48_v4 = vsel %vm43_vm0, %v134_v3, 0  ;;  %v28_v5 = vld [vmem:[%s203_s0] sm:$0x7] }
   0x3   :  { %59 = vmatpush.bf16.xpose.msra.mxu0 %v51_v2  ;;  %v138_v9 = vld [vmem:[%s204_s2] ss:$0 sm:$0xff] }
   0x4   :  { %v139_v36 = vld [vmem:[%s205_s3] ss:$0 sm:$0xff] }
   0x5   :  { %v140_v38 = vld [vmem:[%s206_s4] ss:$0 sm:$0xff] }
   0x7   :  { %v142_v16 = vpop.eup %141 }
   0x8   :  { %v27_v6 = vld [vmem:[#allocation2] sm:$0x3f]  ;;  %v83_v17 = vmul.f32 32.0, %v142_v16  ;;  %vm87_vm2 = vweird.f32 %v142_v16 }
   0xa   :  { %v84_v18 = vsub.f32 1.0, %v83_v17 }
   0xb   :  { %60 = vmatpush.bf16.xpose.msra.mxu0 %v48_v4 }
   0xc   :  { %v85_v19 = vmul.f32 %v142_v16, %v84_v18 }
   0xe   :  { %v86_v20 = vadd.f32 %v142_v16, %v85_v19 }
  0x10   :  { %v88_v21 = vsel %vm87_vm2, %v142_v16, %v86_v20 }
  0x12   :  { %133 = vmatmul.msk.bf16.vlgmr.msra.gmra.mxu0 %vm43_vm0, %v28_v5 }
  0x8f   :  { %v62_v7 = vpop.f32.mrf.mxu0 }
  0x90   :  { %v66_v8 = vadd.f32 %v62_v7, %v27_v6 }
  0x92   :  { %68 = vst.msk [vmem:[#allocation2] sm:$0x3f] %vm25_vm1, %v66_v8 }
  0x97   :  { %v64_v10 = vpop.f32.mrf.mxu0 }
  0x99   :  { %v72_v11 = vld [vmem:[#allocation2] sm:$0x3f] }
  0x9a   :  { %v77_v12 = vadd.f32 %v138_v9, %v72_v11 }
  0x9c   :  { %v78_v13 = vmax.f32 %v77_v12, 0.0 }
  0x9e   :  { %v79_v14 = vsel %vm25_vm1, %v78_v13, 0.0 }
  0x9f   :  { %80 = vadd.xlane.f32.xlu0 %v79_v14 }
 0x112   :  { %v81_v22 = vpop.xlane.xlu0 %80 }
 0x113   :  { %v89_v23 = vmul.f32 %v88_v21, %v81_v22 }
 0x115   :  { %v90_v24 = vsub.f32 %v78_v13, %v89_v23 }
 0x117   :  { %v91_v25 = vmul.f32 %v90_v24, %v90_v24 }
 0x119   :  { %v92_v26 = vsel %vm25_vm1, %v91_v25, 0.0 }
 0x11a   :  { %93 = vadd.xlane.f32.xlu0 %v92_v26 }
 0x18d   :  { %v94_v27 = vpop.xlane.xlu0 %93 }
 0x18e   :  { %v95_v28 = vmul.f32 %v94_v27, %v88_v21 }
 0x190   :  { %v96_v29 = vadd.f32 1e-05, %v95_v28 }
 0x192   :  { %143 = vrsqrt.f32 %v96_v29  ;;  %vm103_vm4 = vweird.f32 %v96_v29 }
 0x198   :  { %v144_v30 = vpop.eup %143 }
 0x199   :  { %v98_v31 = vmul.f32 %v144_v30, %v96_v29  ;;  %vm104_vm3 = vweird.f32 %v144_v30 }
 0x19a   :  { %vm105_vm5 = vmor %vm103_vm4, %vm104_vm3 }
 0x19b   :  { %v99_v32 = vmul.f32 %v144_v30, %v98_v31 }
 0x19d   :  { %v100_v33 = vmul.f32 0.5, %v99_v32 }
 0x19f   :  { %v101_v34 = vsub.f32 1.5, %v100_v33 }
 0x1a1   :  { %v102_v35 = vmul.f32 %v144_v30, %v101_v34 }
 0x1a3   :  { %v106_v37 = vsel %vm105_vm5, %v144_v30, %v102_v35 }
 0x1a4   :  { %v107_v39 = vmul.f32 %v106_v37, %v90_v24 }
 0x1a6   :  { %v112_v40 = vmul.f32 %v139_v36, %v107_v39 }
 0x1a8   :  { %v117_v41 = vadd.f32 %v140_v38, %v112_v40 }
 0x1aa   :  { %v118_v42 = vpack.c.bf16 %v117_v41, %v117_v41 }
 0x1ac   :  { %120 = vst.msk [vmem:[%s207_s5] sm:$0x7] %vm119_vm6, %v118_v42 }

// kernel: bert_forward.25
= control target key start
LH: loop header
LB: loop body
LE: loop exit
PB: predicated region body
PF: predicated region fallthrough
CT: control target
= control target key end

     0   :  { %vm77_vm0 = vcmask 261120   ;;  %v177_v10 = vmov 0.0   ;;  %s240_s1 = inlined_call_operand.vmem [shape: bf16[128,32], index: 1, kind: input, shape index: {}]   ;;  %s241_s2 = inlined_call_operand.vmem [shape: f32[1,128], index: 2, kind: input, shape index: {}]   ;;  %s242_s0 = inlined_call_operand.vmem [shape: bf16[6,32], index: 0, kind: input, shape index: {}]   ;;  %s243_s3 = inlined_call_operand.vmem [shape: f32[6,128], index: 3, kind: output, shape index: {}]  }
   0x1   :  { %v174_v0 = vld [vmem:[%s240_s1 + $0x38] sm:$0xff]  ;;  %v173_v2 = vld [vmem:[%s240_s1 + $0x30] sm:$0xff]  ;;  %v172_v4 = vld [vmem:[%s240_s1 + $0x28] sm:$0xff]  ;;  %18 = vst [vmem:[#allocation2] sm:$0x3f] %v177_v10 }
   0x2   :  { %v103_v1 = vsel %vm77_vm0, %v174_v0, 0  ;;  %v100_v3 = vsel %vm77_vm0, %v173_v2, 0  ;;  %v97_v5 = vsel %vm77_vm0, %v172_v4, 0  ;;  %v171_v6 = vld [vmem:[%s240_s1 + $0x20] sm:$0xff]  ;;  %v170_v8 = vld [vmem:[%s240_s1 + $0x18] sm:$0xff]  ;;  %v169_v11 = vld [vmem:[%s240_s1 + $0x10] sm:$0xff] }
   0x3   :  { %105 = vmatpush.bf16.xpose.msra.mxu0 %v103_v1  ;;  %v94_v7 = vsel %vm77_vm0, %v171_v6, 0  ;;  %v91_v9 = vsel %vm77_vm0, %v170_v8, 0  ;;  %v88_v12 = vsel %vm77_vm0, %v169_v11, 0  ;;  %v168_v13 = vld [vmem:[%s240_s1 + $0x8] sm:$0xff]  ;;  %v167_v15 = vld [vmem:[%s240_s1] sm:$0xff] }
   0x4   :  { %v85_v14 = vsel %vm77_vm0, %v168_v13, 0  ;;  %v82_v16 = vsel %vm77_vm0, %v167_v15, 0  ;;  %v20_v17 = vld [vmem:[%s242_s0] sm:$0x7] }
   0x5   :  { %v176_v21 = vld [vmem:[%s241_s2] ss:$0 sm:$0xff] }
   0x8   :  { %v19_v18 = vld [vmem:[#allocation2] sm:$0x3f] }
   0xb   :  { %106 = vmatpush.bf16.xpose.msra.mxu0 %v100_v3 }
  0x13   :  { %107 = vmatpush.bf16.xpose.msra.mxu0 %v97_v5 }
  0x1b   :  { %108 = vmatpush.bf16.xpose.msra.mxu0 %v94_v7 }
  0x23   :  { %109 = vmatpush.bf16.xpose.msra.mxu0 %v91_v9 }
  0x2b   :  { %110 = vmatpush.bf16.xpose.msra.mxu0 %v88_v12 }
  0x33   :  { %111 = vmatpush.bf16.xpose.msra.mxu0 %v85_v14 }
  0x3b   :  { %112 = vmatpush.bf16.xpose.msra.mxu0 %v82_v16 }
  0x42   :  { %166 = vmatmul.msk.bf16.vlgmr.msra.gmra.mxu0 %vm77_vm0, %v20_v17 }
  0xbf   :  { %v114_v19 = vpop.f32.mrf.mxu0 }
  0xc0   :  { %v118_v20 = vadd.f32 %v114_v19, %v19_v18 }
  0xc2   :  { %119 = vst [vmem:[#allocation2] sm:$0x3f] %v118_v20 }
  0xc7   :  { %v116_v22 = vpop.f32.mrf.mxu0 }
  0xc9   :  { %v123_v23 = vld [vmem:[#allocation2] sm:$0x3f] }
  0xca   :  { %v128_v24 = vadd.f32 %v176_v21, %v123_v23 }
  0xcc   :  { %129 = vst [vmem:[%s243_s3] sm:$0x3f] %v128_v24 }

// kernel: bert_forward.26
= control target key start
LH: loop header
LB: loop body
LE: loop exit
PB: predicated region body
PF: predicated region fallthrough
CT: control target
= control target key end

     0   :  { %vm37_vm0 = vcmask 261120   ;;  %vm19_vm1 = vcmask 254976   ;;  %v95_v1 = vmov 0.0   ;;  %vm74_vm2 = vcmask 253952   ;;  %s133_s1 = inlined_call_operand.vmem [shape: bf16[32,32], index: 1, kind: input, shape index: {}]   ;;  %s134_s2 = inlined_call_operand.vmem [shape: f32[1,32], index: 2, kind: input, shape index: {}]   ;;  %s135_s0 = inlined_call_operand.vmem [shape: bf16[2,32], index: 0, kind: input, shape index: {}]   ;;  %s136_s3 = inlined_call_operand.vmem [shape: bf16[2,32], index: 3, kind: output, shape index: {}]  }
   0x1   :  { %v90_v0 = vld [vmem:[%s133_s1 + $0x8] sm:$0xff]  ;;  %20 = vst.msk [vmem:[#allocation2] sm:$0x3] %vm19_vm1, %v95_v1  ;;  %v89_v3 = vld [vmem:[%s133_s1] sm:$0xff] }
   0x2   :  { %v45_v2 = vsel %vm37_vm0, %v90_v0, 0  ;;  %v42_v4 = vsel %vm37_vm0, %v89_v3, 0  ;;  %v22_v5 = vld [vmem:[%s135_s0] sm:$0x1] }
   0x3   :  { %53 = vmatpush.bf16.xpose.msra.mxu0 %v45_v2  ;;  %v92_v9 = vld [vmem:[%s134_s2] ss:$0 sm:$0xff] }
   0x8   :  { %v21_v6 = vld [vmem:[#allocation2] sm:$0x3] }
   0xb   :  { %54 = vmatpush.bf16.xpose.msra.mxu0 %v42_v4 }
  0x12   :  { %88 = vmatmul.msk.bf16.vlgmr.msra.gmra.mxu0 %vm37_vm0, %v22_v5 }
  0x8f   :  { %v56_v7 = vpop.f32.mrf.mxu0 }
  0x90   :  { %v60_v8 = vadd.f32 %v56_v7, %v21_v6 }
  0x92   :  { %62 = vst.msk [vmem:[#allocation2] sm:$0x3] %vm19_vm1, %v60_v8 }
  0x97   :  { %v58_v10 = vpop.f32.mrf.mxu0 }
  0x99   :  { %v66_v11 = vld [vmem:[#allocation2] sm:$0x3] }
  0x9a   :  { %v71_v12 = vadd.f32 %v92_v9, %v66_v11 }
  0x9c   :  { %93 = vtanh.f32 %v71_v12 }
  0xa2   :  { %v94_v13 = vpop.eup %93 }
  0xa3   :  { %v73_v14 = vpack.c.bf16 %v94_v13, %v94_v13 }
  0xa5   :  { %75 = vst.msk [vmem:[%s136_s3] sm:$0x1] %vm74_vm2, %v73_v14 }

// kernel: bert_forward.27
= control target key start
LH: loop header
LB: loop body
LE: loop exit
PB: predicated region body
PF: predicated region fallthrough
CT: control target
= control target key end

     0   :  { %vm25_vm0 = vcmask 261120   ;;  %vm20_vm1 = vcmask 9216   ;;  %s141_s0 = inlined_call_operand.vmem [shape: bf16[2,32], index: 0, kind: input, shape index: {}]   ;;  %s142_s1 = inlined_call_operand.vmem [shape: bf16[2,32], index: 1, kind: input, shape index: {}]   ;;  %s143_s2 = inlined_call_operand.vmem [shape: f32[1,2], index: 2, kind: input, shape index: {}]   ;;  %s144_s3 = inlined_call_operand.hbm [shape: f32[2,2], index: 3, kind: output, shape index: {}]  }
   0x1   :  { %v24_v0 = vld [vmem:[%s142_s1] sm:$0x1] }
   0x2   :  { %v30_v1 = vsel %vm25_vm0, %v24_v0, 0 }
   0x3   :  { %8 = vsyncpa [#allocation4], 0  ;;  %39 = vmatpush.bf16.xpose.msra.mxu0 %v30_v1  ;;  %v104_v2 = vmov 0.0   ;;  %v23_v3 = vld [vmem:[%s141_s0] sm:$0x1]  ;;  %s105_s17 = smov [#allocation3]  }
   0x4   :  { %21 = vst.msk [vmem:[#allocation2] sm:$0x3] %vm20_vm1, %v104_v2  ;;  %v77_v7 = vld [vmem:[%s143_s2] ss:$0 sm:$0xff]  ;;  %s63_s18 = sshll.u32 %s105_s17, 4  ;;  %s65_s21 = sshll.u32 %s144_s3, 4  ;;  %s64_s18 = int_to_ptr.vmem [resolvable:$true] %s63_s18  ;;  %s66_s21 = int_to_ptr.hbm [resolvable:$true] %s65_s21 }
   0xa   :  { %74 = vmatmul.msk.bf16.vlgmr.msra.gmra.mxu0 %vm25_vm0, %v23_v3 }
   0xb   :  { %v22_v4 = vld [vmem:[#allocation2] sm:$0x3] }
  0x87   :  { %v41_v5 = vpop.f32.mrf.mxu0 }
  0x88   :  { %v45_v6 = vadd.f32 %v41_v5, %v22_v4 }
  0x8a   :  { %47 = vst.msk [vmem:[#allocation2] sm:$0x3] %vm20_vm1, %v45_v6 }
  0x8f   :  { %v43_v8 = vpop.f32.mrf.mxu0 }
  0x91   :  { %v51_v9 = vld [vmem:[#allocation2] sm:$0x3] }
  0x92   :  { %v56_v10 = vadd.f32 %v77_v7, %v51_v9 }
  0x94   :  { %57 = vst.msk [vmem:[#allocation3] sm:$0x3] %vm20_vm1, %v56_v10 }
  0x95   :  { %68 = dma.vmem_to_hbm [thread:$0]  %s64_s18, 32, %s66_s21, [#allocation4]  }
  0x96   :  { %102 = dma.done.wait [#allocation4], 32  }
  0x97   :  { %103 = vsyncadd [#allocation4], 4294967264 }
  0x98   :  { %73 = vsyncpa [#allocation4], 1 }

</bundles_post_ra>
